<compile_context>
chip_gen: v5e
topology: v5e:2x2
jax: 0.10.0
libtpu: 0.0.40
codegen_flags: <defaults>
</compile_context>

<pallas_src>
import functools

import numpy as np
import jax
import jax.numpy as jnp
from jax import lax
from jax.experimental import pallas as pl
from jax.experimental.pallas import tpu as pltpu


# ------------------------------ block-batch pick ---------------------------- #

def _choose_block_batch(batch_padded):
    """Images per grid step.  `batch_padded` is a multiple of 8.

    Picks a multiple of 8 that divides the batch, capped at 64, preferring a
    choice that yields >= 2 grid steps (so v7x's two TensorCores both work).
    """
    candidates = [bb for bb in range(8, min(64, batch_padded) + 1, 8)
                  if batch_padded % bb == 0]
    if not candidates:
        return batch_padded
    multi = [bb for bb in candidates if batch_padded // bb >= 2]
    return max(multi) if multi else max(candidates)


# ------------------------------- fused kernel ------------------------------- #

def _fused_forward_kernel(x_ref, a1c_ref, b1_ref, a2w_ref, b2_ref, g1_ref,
                          fb1_ref, w2_ref, fb2_ref, w3_ref, ob_ref,
                          out_ref, p1_ref, *, bb):
    """Whole forward for a block of `bb` images, entirely VMEM-resident.

    x_ref : (24, bb, 140) bf16   row-im2col'd input [conv-row, batch, kh*28+w]
    a1c_ref: (140, 256)   bf16   conv1 band, kh folded into K, pc in 128-slots
    a2w_ref: (72, 1280)   bf16   conv2 band, (kh,pc) taps in 128-lane slots
    g1_ref : (4, 48, 120) bf16   fc1 weights with NCHW flatten folded in
    p1_ref : (12*bb, 72)  bf16   scratch: pooled conv1 activations (h-major rows)
    out_ref: (bb, 128)    f32    lane-dense logits tile (cols 10..127 unused)
    """
    f32 = jnp.float32
    bf16 = jnp.bfloat16

    # ---------------- conv1: ONE matmul (kh folded into K=140) --------------- #
    # Free reshape: leading dim collapses into 8-aligned sublanes (bb % 8 == 0).
    x2d = x_ref[...].reshape(24 * bb, 140)
    t1 = jnp.dot(x2d, a1c_ref[...], preferred_element_type=f32)   # (24*bb, 256)

    # bias + relu fused with the 2x2 maxpool (relu/bias commute with the max);
    # row decimation = static 8-aligned sublane slices, NOT selection matmuls.
    b1v = b1_ref[...]                                             # (1, 72)
    for i in range(12):                         # pooled output row
        m = None
        for pr in range(2):                     # row phase of the pool window
            r = (2 * i + pr) * bb
            for pc in range(2):                 # col phase (lane slot)
                s = t1[r:r + bb, pc * 128:pc * 128 + 72]
                m = s if m is None else jnp.maximum(m, s)
        p1_ref[i * bb:(i + 1) * bb, :] = jnp.maximum(m + b1v, 0.0).astype(bf16)

    # ---------------- conv2: ONE wide matmul, taps in lane slots ------------- #
    t2 = jnp.dot(p1_ref[...], a2w_ref[...],
                 preferred_element_type=f32)                      # (12*bb, 1280)

    b2v = b2_ref[...]                                             # (1, 48)
    y1 = None
    for i in range(4):                          # pooled output row
        m = None
        for pr in range(2):
            for pc in range(2):
                acc = None
                for kh in range(5):             # sum over conv2 row taps
                    r = (2 * i + pr + kh) * bb
                    c = (kh * 2 + pc) * 128
                    s = t2[r:r + bb, c:c + 48]
                    acc = s if acc is None else acc + s
                m = acc if m is None else jnp.maximum(m, acc)
        a2 = jnp.maximum(m + b2v, 0.0).astype(bf16)               # (bb, 48)
        # fc1 fused into the pool loop (flatten permutation folded into g1)
        g = jnp.dot(a2, g1_ref[i], preferred_element_type=f32)    # (bb, 120)
        y1 = g if y1 is None else y1 + g

    # ---------------- fc1 bias/relu, fc2, output layer ----------------------- #
    y1 = jnp.maximum(y1 + fb1_ref[...], 0.0).astype(bf16)         # (bb, 120)
    y2 = jnp.maximum(jnp.dot(y1, w2_ref[...], preferred_element_type=f32)
                     + fb2_ref[...], 0.0).astype(bf16)            # (bb, 60)
    logits = jnp.dot(y2, w3_ref[...], preferred_element_type=f32) + ob_ref[...]
    out_ref[...] = logits                                         # (bb, 128)


# ------------------------- one-time parameter prep -------------------------- #

def prepare_params(params):
    """Build band / permuted-weight matrices once.  Batch-independent."""
    (w1, b1, w2, b2, fw1, fb1, fw2, fb2, ow, ob) = params
    f32, bf16 = jnp.float32, jnp.bfloat16

    # conv1 band, kh folded into K: a1c[kh*28+w, pc*128 + j*6+oc] = w1[oc,0,kh,kw]
    # with w = 2j+pc+kw (VALID conv, output col ow = 2j+pc).
    a1c = np.zeros((140, 256), np.float32)
    w1n = np.asarray(w1, np.float32)                       # (6,1,5,5)
    for kh in range(5):
        for pc in range(2):
            for j in range(12):
                for kw in range(5):
                    w = 2 * j + pc + kw
                    a1c[kh * 28 + w, pc * 128 + j * 6:pc * 128 + j * 6 + 6] = \
                        w1n[:, 0, kh, kw]

    # conv2 band, (kh,pc) taps in 128-lane slots:
    # a2w[w*6+ci, (kh*2+pc)*128 + j*12+oc] = w2[oc,ci,kh,kw], w = 2j+pc+kw.
    a2w = np.zeros((72, 1280), np.float32)
    w2n = np.asarray(w2, np.float32)                       # (12,6,5,5)
    for kh in range(5):
        for pc in range(2):
            t = kh * 2 + pc
            for j in range(4):
                for kw in range(5):
                    w = 2 * j + pc + kw
                    for ci in range(6):
                        a2w[w * 6 + ci,
                            t * 128 + j * 12:t * 128 + j * 12 + 12] = w2n[:, ci, kh, kw]

    # fc1 weights with PyTorch's NCHW flatten (c*16+h*4+w) folded into a
    # permutation; kernel's pooled layout is rows=(h), lanes=(w*12+c).
    g1 = np.transpose(np.asarray(fw1, np.float32).reshape(120, 12, 4, 4),
                      (2, 3, 1, 0)).reshape(4, 48, 120)

    b1r = jnp.tile(jnp.asarray(b1, f32), 12).reshape(1, 72)
    b2r = jnp.tile(jnp.asarray(b2, f32), 4).reshape(1, 48)
    fb1r = jnp.asarray(fb1, f32).reshape(1, 120)
    w2m = jnp.asarray(fw2, f32).T.astype(bf16)             # (120, 60)
    fb2r = jnp.asarray(fb2, f32).reshape(1, 60)
    w3m = jnp.zeros((60, 128), f32).at[:, :10].set(jnp.asarray(ow, f32).T)
    obr = jnp.zeros((1, 128), f32).at[0, :10].set(jnp.asarray(ob, f32))

    return (jnp.asarray(a1c, bf16), b1r, jnp.asarray(a2w, bf16), b2r,
            jnp.asarray(g1, bf16), fb1r, w2m, fb2r, w3m.astype(bf16), obr)


# ------------------------------ full forward -------------------------------- #

def network_forward(x_nchw, prepped):
    """x_nchw: (B, 1, 28, 28) float32 -> logits (B, 10)."""
    (a1c, b1r, a2w, b2r, g1, fb1r, w2m, fb2r, w3m, obr) = prepped
    B = x_nchw.shape[0]
    Bp = -(-B // 8) * 8                       # pad batch to a multiple of 8
    bb = _choose_block_batch(Bp)

    # Row-only im2col (x5 ~ 7 KB/image bf16) + [h, b, w] layout, done in XLA.
    x3 = x_nchw.reshape(B, 28, 28).astype(jnp.float32)
    xh = jnp.transpose(x3, (1, 0, 2))                           # (28, B, 28)
    x5 = jnp.concatenate([xh[kh:kh + 24] for kh in range(5)], axis=-1)  # (24,B,140)
    if Bp != B:
        x5 = jnp.pad(x5, ((0, 0), (0, Bp - B), (0, 0)))
    x5 = x5.astype(jnp.bfloat16)                                # (24, Bp, 140)

    def _full_spec(a):
        zeros = (0,) * a.ndim
        return pl.BlockSpec(a.shape, lambda g, _z=zeros: _z)

    in_specs = [
        pl.BlockSpec((24, bb, 140), lambda g: (0, g, 0)),       # x block per step
        _full_spec(a1c), _full_spec(b1r), _full_spec(a2w), _full_spec(b2r),
        _full_spec(g1), _full_spec(fb1r), _full_spec(w2m), _full_spec(fb2r),
        _full_spec(w3m), _full_spec(obr),
    ]
    out_spec = pl.BlockSpec((bb, 128), lambda g: (g, 0))        # lane-dense tile

    flops_per_img = 2 * (24 * 140 * 256 + 12 * 72 * 1280
                         + 4 * 48 * 120 + 120 * 60 + 60 * 128)
    weight_bytes = sum(int(w.size) * w.dtype.itemsize for w in prepped)
    cost = pl.CostEstimate(
        flops=int(Bp) * flops_per_img,
        transcendentals=0,
        bytes_accessed=int(x5.size) * x5.dtype.itemsize
        + weight_bytes + int(Bp) * 128 * 4)

    kernel = functools.partial(_fused_forward_kernel, bb=bb)

    out_padded = pl.pallas_call(
        kernel,
        out_shape=jax.ShapeDtypeStruct((Bp, 128), jnp.float32),
        grid=(Bp // bb,),
        in_specs=in_specs,
        out_specs=out_spec,
        scratch_shapes=[pltpu.VMEM((12 * bb, 72), jnp.bfloat16)],
        compiler_params=pltpu.CompilerParams(
            dimension_semantics=("parallel",),
            vmem_limit_bytes=32 * 1024 * 1024),
        cost_estimate=cost,
    )(x5, a1c, b1r, a2w, b2r, g1, fb1r, w2m, fb2r, w3m, obr)

    return out_padded[:B, :10]


# ----------------------------- pure-JAX reference --------------------------- #

def reference_forward(x_nchw, params):
    (w1, b1, w2, b2, fw1, fb1, fw2, fb2, ow, ob) = params
    dn = ("NCHW", "OIHW", "NCHW")

    def conv_relu(x, w, b):
        y = lax.conv_general_dilated(x, w, (1, 1), "VALID", dimension_numbers=dn)
        return jnp.maximum(y + b[None, :, None, None], 0.0)

    def pool(x):
        return lax.reduce_window(x, -jnp.inf, lax.max,
                                 (1, 1, 2, 2), (1, 1, 2, 2), "VALID")

    x = pool(conv_relu(x_nchw, w1, b1))
    x = pool(conv_relu(x, w2, b2))
    x = x.reshape(x.shape[0], -1)
    x = jnp.maximum(x @ fw1.T + fb1, 0.0)
    x = jnp.maximum(x @ fw2.T + fb2, 0.0)
    return x @ ow.T + ob


# ---------------------------------- main ------------------------------------ #

def init_params(key):
    ks = jax.random.split(key, 10)
    def w(k, shape, fan_in):
        return (jax.random.normal(k, shape, jnp.float32) / jnp.sqrt(fan_in))
    w1 = w(ks[0], (6, 1, 5, 5), 25);     b1 = w(ks[1], (6,), 25)
    w2 = w(ks[2], (12, 6, 5, 5), 150);   b2 = w(ks[3], (12,), 150)
    fw1 = w(ks[4], (120, 192), 192);     fb1 = w(ks[5], (120,), 192)
    fw2 = w(ks[6], (60, 120), 120);      fb2 = w(ks[7], (60,), 120)
    ow = w(ks[8], (10, 60), 60);         ob = w(ks[9], (10,), 60)
    return (w1, b1, w2, b2, fw1, fb1, fw2, fb2, ow, ob)


if __name__ == "__main__":
    key = jax.random.PRNGKey(0)
    kx, kp, kx2 = jax.random.split(key, 3)
    params = init_params(kp)
    prepped = prepare_params(params)          # one-time, batch-independent
    fwd = jax.jit(network_forward)

    # batch=2, MNIST-sized spatial (28x28) is required by fc1 = 12*4*4.
    x = jax.random.normal(kx, (2, 1, 28, 28), jnp.float32)
    out = jax.block_until_ready(fwd(x, prepped))
    assert out.shape == (2, 10), out.shape
    ref = reference_forward(x, params)
    err = float(jnp.max(jnp.abs(out - ref)))
    assert jnp.allclose(out, ref, atol=5e-2, rtol=5e-2), err   # bf16 MXU inputs

    # second check: batch that exercises a multi-step grid (>= 2 TC-parallel steps)
    x2 = jax.random.normal(kx2, (32, 1, 28, 28), jnp.float32)
    out2 = jax.block_until_ready(fwd(x2, prepped))
    ref2 = reference_forward(x2, params)
    err2 = float(jnp.max(jnp.abs(out2 - ref2)))
    assert jnp.allclose(out2, ref2, atol=5e-2, rtol=5e-2), err2

    print("KERNEL_OK")
</pallas_src>

<mosaic_0001>
module attributes {stable_mosaic.version = 11 : i64} {
  func.func @_fused_forward_kernel(%arg0: i32, %arg1: memref<24x8x140xbf16, #tpu.memory_space<vmem>>, %arg2: memref<140x256xbf16, #tpu.memory_space<vmem>>, %arg3: memref<1x72xf32, #tpu.memory_space<vmem>>, %arg4: memref<72x1280xbf16, #tpu.memory_space<vmem>>, %arg5: memref<1x48xf32, #tpu.memory_space<vmem>>, %arg6: memref<4x48x120xbf16, #tpu.memory_space<vmem>>, %arg7: memref<1x120xf32, #tpu.memory_space<vmem>>, %arg8: memref<120x60xbf16, #tpu.memory_space<vmem>>, %arg9: memref<1x60xf32, #tpu.memory_space<vmem>>, %arg10: memref<60x128xbf16, #tpu.memory_space<vmem>>, %arg11: memref<1x128xf32, #tpu.memory_space<vmem>>, %arg12: memref<8x128xf32, #tpu.memory_space<vmem>>, %arg13: memref<96x72xbf16, #tpu.memory_space<vmem>>) attributes {dimension_semantics = [#tpu.dimension_semantics<parallel>], iteration_bounds = array<i64: 1>, scalar_prefetch = 0 : i64, scratch_operands = 1 : i64, tpu.core_type = #tpu.core_type<tc>, window_params = [{transform_indices = @transform_0, window_bounds = array<i64: 24, 8, 140>}, {pipeline_mode = #tpu.pipeline_mode<synchronous>, transform_indices = @transform_1, window_bounds = array<i64: 140, 256>}, {pipeline_mode = #tpu.pipeline_mode<synchronous>, transform_indices = @transform_2, window_bounds = array<i64: 1, 72>}, {pipeline_mode = #tpu.pipeline_mode<synchronous>, transform_indices = @transform_3, window_bounds = array<i64: 72, 1280>}, {pipeline_mode = #tpu.pipeline_mode<synchronous>, transform_indices = @transform_4, window_bounds = array<i64: 1, 48>}, {pipeline_mode = #tpu.pipeline_mode<synchronous>, transform_indices = @transform_5, window_bounds = array<i64: 4, 48, 120>}, {pipeline_mode = #tpu.pipeline_mode<synchronous>, transform_indices = @transform_6, window_bounds = array<i64: 1, 120>}, {pipeline_mode = #tpu.pipeline_mode<synchronous>, transform_indices = @transform_7, window_bounds = array<i64: 120, 60>}, {pipeline_mode = #tpu.pipeline_mode<synchronous>, transform_indices = @transform_8, window_bounds = array<i64: 1, 60>}, {pipeline_mode = #tpu.pipeline_mode<synchronous>, transform_indices = @transform_9, window_bounds = array<i64: 60, 128>}, {pipeline_mode = #tpu.pipeline_mode<synchronous>, transform_indices = @transform_10, window_bounds = array<i64: 1, 128>}, {transform_indices = @transform_11, window_bounds = array<i64: 8, 128>}]} {
    %c0 = arith.constant 0 : index
    %c0_0 = arith.constant 0 : index
    %c0_1 = arith.constant 0 : index
    %0 = vector.load %arg1[%c0, %c0_0, %c0_1] : memref<24x8x140xbf16, #tpu.memory_space<vmem>>, vector<24x8x140xbf16>
    %1 = vector.shape_cast %0 : vector<24x8x140xbf16> to vector<192x140xbf16>
    %c0_2 = arith.constant 0 : index
    %c0_3 = arith.constant 0 : index
    %2 = vector.load %arg2[%c0_2, %c0_3] : memref<140x256xbf16, #tpu.memory_space<vmem>>, vector<140x256xbf16>
    %cst = arith.constant dense<0.000000e+00> : vector<192x256xf32>
    %3 = tpu.matmul %1, %2, %cst {dimension_numbers = #tpu.dot_dimension_numbers<[1], [0], [0], [1], [0, 0, 1, 1], [], []>} : vector<192x140xbf16>, vector<140x256xbf16>, vector<192x256xf32> -> vector<192x256xf32>
    %c0_4 = arith.constant 0 : index
    %c0_5 = arith.constant 0 : index
    %4 = vector.load %arg3[%c0_4, %c0_5] : memref<1x72xf32, #tpu.memory_space<vmem>>, vector<1x72xf32>
    %5 = vector.extract_strided_slice %3 {offsets = [0, 0], sizes = [8, 72], strides = [1, 1]} : vector<192x256xf32> to vector<8x72xf32>
    %6 = vector.extract_strided_slice %3 {offsets = [0, 128], sizes = [8, 72], strides = [1, 1]} : vector<192x256xf32> to vector<8x72xf32>
    %7 = arith.maximumf %5, %6 : vector<8x72xf32>
    %8 = vector.extract_strided_slice %3 {offsets = [8, 0], sizes = [8, 72], strides = [1, 1]} : vector<192x256xf32> to vector<8x72xf32>
    %9 = arith.maximumf %7, %8 : vector<8x72xf32>
    %10 = vector.extract_strided_slice %3 {offsets = [8, 128], sizes = [8, 72], strides = [1, 1]} : vector<192x256xf32> to vector<8x72xf32>
    %11 = arith.maximumf %9, %10 : vector<8x72xf32>
    %12 = vector.broadcast %4 : vector<1x72xf32> to vector<8x72xf32>
    %13 = arith.addf %11, %12 : vector<8x72xf32>
    %cst_6 = arith.constant 0.000000e+00 : f32
    %14 = vector.broadcast %cst_6 : f32 to vector<8x72xf32>
    %15 = arith.maximumf %13, %14 : vector<8x72xf32>
    %16 = arith.truncf %15 : vector<8x72xf32> to vector<8x72xbf16>
    %c0_7 = arith.constant 0 : index
    %c0_8 = arith.constant 0 : index
    %17 = vector.load %arg13[%c0_7, %c0_8] : memref<96x72xbf16, #tpu.memory_space<vmem>>, vector<8x72xbf16>
    tpu.vector_store %arg13[%c0_7, %c0_8], %16 {strides = array<i32>} : memref<96x72xbf16, #tpu.memory_space<vmem>>, vector<8x72xbf16>,
    %18 = vector.extract_strided_slice %3 {offsets = [16, 0], sizes = [8, 72], strides = [1, 1]} : vector<192x256xf32> to vector<8x72xf32>
    %19 = vector.extract_strided_slice %3 {offsets = [16, 128], sizes = [8, 72], strides = [1, 1]} : vector<192x256xf32> to vector<8x72xf32>
    %20 = arith.maximumf %18, %19 : vector<8x72xf32>
    %21 = vector.extract_strided_slice %3 {offsets = [24, 0], sizes = [8, 72], strides = [1, 1]} : vector<192x256xf32> to vector<8x72xf32>
    %22 = arith.maximumf %20, %21 : vector<8x72xf32>
    %23 = vector.extract_strided_slice %3 {offsets = [24, 128], sizes = [8, 72], strides = [1, 1]} : vector<192x256xf32> to vector<8x72xf32>
    %24 = arith.maximumf %22, %23 : vector<8x72xf32>
    %25 = vector.broadcast %4 : vector<1x72xf32> to vector<8x72xf32>
    %26 = arith.addf %24, %25 : vector<8x72xf32>
    %cst_9 = arith.constant 0.000000e+00 : f32
    %27 = vector.broadcast %cst_9 : f32 to vector<8x72xf32>
    %28 = arith.maximumf %26, %27 : vector<8x72xf32>
    %29 = arith.truncf %28 : vector<8x72xf32> to vector<8x72xbf16>
    %c8 = arith.constant 8 : index
    %c0_10 = arith.constant 0 : index
    %30 = vector.load %arg13[%c8, %c0_10] : memref<96x72xbf16, #tpu.memory_space<vmem>>, vector<8x72xbf16>
    tpu.vector_store %arg13[%c8, %c0_10], %29 {strides = array<i32>} : memref<96x72xbf16, #tpu.memory_space<vmem>>, vector<8x72xbf16>,
    %31 = vector.extract_strided_slice %3 {offsets = [32, 0], sizes = [8, 72], strides = [1, 1]} : vector<192x256xf32> to vector<8x72xf32>
    %32 = vector.extract_strided_slice %3 {offsets = [32, 128], sizes = [8, 72], strides = [1, 1]} : vector<192x256xf32> to vector<8x72xf32>
    %33 = arith.maximumf %31, %32 : vector<8x72xf32>
    %34 = vector.extract_strided_slice %3 {offsets = [40, 0], sizes = [8, 72], strides = [1, 1]} : vector<192x256xf32> to vector<8x72xf32>
    %35 = arith.maximumf %33, %34 : vector<8x72xf32>
    %36 = vector.extract_strided_slice %3 {offsets = [40, 128], sizes = [8, 72], strides = [1, 1]} : vector<192x256xf32> to vector<8x72xf32>
    %37 = arith.maximumf %35, %36 : vector<8x72xf32>
    %38 = vector.broadcast %4 : vector<1x72xf32> to vector<8x72xf32>
    %39 = arith.addf %37, %38 : vector<8x72xf32>
    %cst_11 = arith.constant 0.000000e+00 : f32
    %40 = vector.broadcast %cst_11 : f32 to vector<8x72xf32>
    %41 = arith.maximumf %39, %40 : vector<8x72xf32>
    %42 = arith.truncf %41 : vector<8x72xf32> to vector<8x72xbf16>
    %c16 = arith.constant 16 : index
    %c0_12 = arith.constant 0 : index
    %43 = vector.load %arg13[%c16, %c0_12] : memref<96x72xbf16, #tpu.memory_space<vmem>>, vector<8x72xbf16>
    tpu.vector_store %arg13[%c16, %c0_12], %42 {strides = array<i32>} : memref<96x72xbf16, #tpu.memory_space<vmem>>, vector<8x72xbf16>,
    %44 = vector.extract_strided_slice %3 {offsets = [48, 0], sizes = [8, 72], strides = [1, 1]} : vector<192x256xf32> to vector<8x72xf32>
    %45 = vector.extract_strided_slice %3 {offsets = [48, 128], sizes = [8, 72], strides = [1, 1]} : vector<192x256xf32> to vector<8x72xf32>
    %46 = arith.maximumf %44, %45 : vector<8x72xf32>
    %47 = vector.extract_strided_slice %3 {offsets = [56, 0], sizes = [8, 72], strides = [1, 1]} : vector<192x256xf32> to vector<8x72xf32>
    %48 = arith.maximumf %46, %47 : vector<8x72xf32>
    %49 = vector.extract_strided_slice %3 {offsets = [56, 128], sizes = [8, 72], strides = [1, 1]} : vector<192x256xf32> to vector<8x72xf32>
    %50 = arith.maximumf %48, %49 : vector<8x72xf32>
    %51 = vector.broadcast %4 : vector<1x72xf32> to vector<8x72xf32>
    %52 = arith.addf %50, %51 : vector<8x72xf32>
    %cst_13 = arith.constant 0.000000e+00 : f32
    %53 = vector.broadcast %cst_13 : f32 to vector<8x72xf32>
    %54 = arith.maximumf %52, %53 : vector<8x72xf32>
    %55 = arith.truncf %54 : vector<8x72xf32> to vector<8x72xbf16>
    %c24 = arith.constant 24 : index
    %c0_14 = arith.constant 0 : index
    %56 = vector.load %arg13[%c24, %c0_14] : memref<96x72xbf16, #tpu.memory_space<vmem>>, vector<8x72xbf16>
    tpu.vector_store %arg13[%c24, %c0_14], %55 {strides = array<i32>} : memref<96x72xbf16, #tpu.memory_space<vmem>>, vector<8x72xbf16>,
    %57 = vector.extract_strided_slice %3 {offsets = [64, 0], sizes = [8, 72], strides = [1, 1]} : vector<192x256xf32> to vector<8x72xf32>
    %58 = vector.extract_strided_slice %3 {offsets = [64, 128], sizes = [8, 72], strides = [1, 1]} : vector<192x256xf32> to vector<8x72xf32>
    %59 = arith.maximumf %57, %58 : vector<8x72xf32>
    %60 = vector.extract_strided_slice %3 {offsets = [72, 0], sizes = [8, 72], strides = [1, 1]} : vector<192x256xf32> to vector<8x72xf32>
    %61 = arith.maximumf %59, %60 : vector<8x72xf32>
    %62 = vector.extract_strided_slice %3 {offsets = [72, 128], sizes = [8, 72], strides = [1, 1]} : vector<192x256xf32> to vector<8x72xf32>
    %63 = arith.maximumf %61, %62 : vector<8x72xf32>
    %64 = vector.broadcast %4 : vector<1x72xf32> to vector<8x72xf32>
    %65 = arith.addf %63, %64 : vector<8x72xf32>
    %cst_15 = arith.constant 0.000000e+00 : f32
    %66 = vector.broadcast %cst_15 : f32 to vector<8x72xf32>
    %67 = arith.maximumf %65, %66 : vector<8x72xf32>
    %68 = arith.truncf %67 : vector<8x72xf32> to vector<8x72xbf16>
    %c32 = arith.constant 32 : index
    %c0_16 = arith.constant 0 : index
    %69 = vector.load %arg13[%c32, %c0_16] : memref<96x72xbf16, #tpu.memory_space<vmem>>, vector<8x72xbf16>
    tpu.vector_store %arg13[%c32, %c0_16], %68 {strides = array<i32>} : memref<96x72xbf16, #tpu.memory_space<vmem>>, vector<8x72xbf16>,
    %70 = vector.extract_strided_slice %3 {offsets = [80, 0], sizes = [8, 72], strides = [1, 1]} : vector<192x256xf32> to vector<8x72xf32>
    %71 = vector.extract_strided_slice %3 {offsets = [80, 128], sizes = [8, 72], strides = [1, 1]} : vector<192x256xf32> to vector<8x72xf32>
    %72 = arith.maximumf %70, %71 : vector<8x72xf32>
    %73 = vector.extract_strided_slice %3 {offsets = [88, 0], sizes = [8, 72], strides = [1, 1]} : vector<192x256xf32> to vector<8x72xf32>
    %74 = arith.maximumf %72, %73 : vector<8x72xf32>
    %75 = vector.extract_strided_slice %3 {offsets = [88, 128], sizes = [8, 72], strides = [1, 1]} : vector<192x256xf32> to vector<8x72xf32>
    %76 = arith.maximumf %74, %75 : vector<8x72xf32>
    %77 = vector.broadcast %4 : vector<1x72xf32> to vector<8x72xf32>
    %78 = arith.addf %76, %77 : vector<8x72xf32>
    %cst_17 = arith.constant 0.000000e+00 : f32
    %79 = vector.broadcast %cst_17 : f32 to vector<8x72xf32>
    %80 = arith.maximumf %78, %79 : vector<8x72xf32>
    %81 = arith.truncf %80 : vector<8x72xf32> to vector<8x72xbf16>
    %c40 = arith.constant 40 : index
    %c0_18 = arith.constant 0 : index
    %82 = vector.load %arg13[%c40, %c0_18] : memref<96x72xbf16, #tpu.memory_space<vmem>>, vector<8x72xbf16>
    tpu.vector_store %arg13[%c40, %c0_18], %81 {strides = array<i32>} : memref<96x72xbf16, #tpu.memory_space<vmem>>, vector<8x72xbf16>,
    %83 = vector.extract_strided_slice %3 {offsets = [96, 0], sizes = [8, 72], strides = [1, 1]} : vector<192x256xf32> to vector<8x72xf32>
    %84 = vector.extract_strided_slice %3 {offsets = [96, 128], sizes = [8, 72], strides = [1, 1]} : vector<192x256xf32> to vector<8x72xf32>
    %85 = arith.maximumf %83, %84 : vector<8x72xf32>
    %86 = vector.extract_strided_slice %3 {offsets = [104, 0], sizes = [8, 72], strides = [1, 1]} : vector<192x256xf32> to vector<8x72xf32>
    %87 = arith.maximumf %85, %86 : vector<8x72xf32>
    %88 = vector.extract_strided_slice %3 {offsets = [104, 128], sizes = [8, 72], strides = [1, 1]} : vector<192x256xf32> to vector<8x72xf32>
    %89 = arith.maximumf %87, %88 : vector<8x72xf32>
    %90 = vector.broadcast %4 : vector<1x72xf32> to vector<8x72xf32>
    %91 = arith.addf %89, %90 : vector<8x72xf32>
    %cst_19 = arith.constant 0.000000e+00 : f32
    %92 = vector.broadcast %cst_19 : f32 to vector<8x72xf32>
    %93 = arith.maximumf %91, %92 : vector<8x72xf32>
    %94 = arith.truncf %93 : vector<8x72xf32> to vector<8x72xbf16>
    %c48 = arith.constant 48 : index
    %c0_20 = arith.constant 0 : index
    %95 = vector.load %arg13[%c48, %c0_20] : memref<96x72xbf16, #tpu.memory_space<vmem>>, vector<8x72xbf16>
    tpu.vector_store %arg13[%c48, %c0_20], %94 {strides = array<i32>} : memref<96x72xbf16, #tpu.memory_space<vmem>>, vector<8x72xbf16>,
    %96 = vector.extract_strided_slice %3 {offsets = [112, 0], sizes = [8, 72], strides = [1, 1]} : vector<192x256xf32> to vector<8x72xf32>
    %97 = vector.extract_strided_slice %3 {offsets = [112, 128], sizes = [8, 72], strides = [1, 1]} : vector<192x256xf32> to vector<8x72xf32>
    %98 = arith.maximumf %96, %97 : vector<8x72xf32>
    %99 = vector.extract_strided_slice %3 {offsets = [120, 0], sizes = [8, 72], strides = [1, 1]} : vector<192x256xf32> to vector<8x72xf32>
    %100 = arith.maximumf %98, %99 : vector<8x72xf32>
    %101 = vector.extract_strided_slice %3 {offsets = [120, 128], sizes = [8, 72], strides = [1, 1]} : vector<192x256xf32> to vector<8x72xf32>
    %102 = arith.maximumf %100, %101 : vector<8x72xf32>
    %103 = vector.broadcast %4 : vector<1x72xf32> to vector<8x72xf32>
    %104 = arith.addf %102, %103 : vector<8x72xf32>
    %cst_21 = arith.constant 0.000000e+00 : f32
    %105 = vector.broadcast %cst_21 : f32 to vector<8x72xf32>
    %106 = arith.maximumf %104, %105 : vector<8x72xf32>
    %107 = arith.truncf %106 : vector<8x72xf32> to vector<8x72xbf16>
    %c56 = arith.constant 56 : index
    %c0_22 = arith.constant 0 : index
    %108 = vector.load %arg13[%c56, %c0_22] : memref<96x72xbf16, #tpu.memory_space<vmem>>, vector<8x72xbf16>
    tpu.vector_store %arg13[%c56, %c0_22], %107 {strides = array<i32>} : memref<96x72xbf16, #tpu.memory_space<vmem>>, vector<8x72xbf16>,
    %109 = vector.extract_strided_slice %3 {offsets = [128, 0], sizes = [8, 72], strides = [1, 1]} : vector<192x256xf32> to vector<8x72xf32>
    %110 = vector.extract_strided_slice %3 {offsets = [128, 128], sizes = [8, 72], strides = [1, 1]} : vector<192x256xf32> to vector<8x72xf32>
    %111 = arith.maximumf %109, %110 : vector<8x72xf32>
    %112 = vector.extract_strided_slice %3 {offsets = [136, 0], sizes = [8, 72], strides = [1, 1]} : vector<192x256xf32> to vector<8x72xf32>
    %113 = arith.maximumf %111, %112 : vector<8x72xf32>
    %114 = vector.extract_strided_slice %3 {offsets = [136, 128], sizes = [8, 72], strides = [1, 1]} : vector<192x256xf32> to vector<8x72xf32>
    %115 = arith.maximumf %113, %114 : vector<8x72xf32>
    %116 = vector.broadcast %4 : vector<1x72xf32> to vector<8x72xf32>
    %117 = arith.addf %115, %116 : vector<8x72xf32>
    %cst_23 = arith.constant 0.000000e+00 : f32
    %118 = vector.broadcast %cst_23 : f32 to vector<8x72xf32>
    %119 = arith.maximumf %117, %118 : vector<8x72xf32>
    %120 = arith.truncf %119 : vector<8x72xf32> to vector<8x72xbf16>
    %c64 = arith.constant 64 : index
    %c0_24 = arith.constant 0 : index
    %121 = vector.load %arg13[%c64, %c0_24] : memref<96x72xbf16, #tpu.memory_space<vmem>>, vector<8x72xbf16>
    tpu.vector_store %arg13[%c64, %c0_24], %120 {strides = array<i32>} : memref<96x72xbf16, #tpu.memory_space<vmem>>, vector<8x72xbf16>,
    %122 = vector.extract_strided_slice %3 {offsets = [144, 0], sizes = [8, 72], strides = [1, 1]} : vector<192x256xf32> to vector<8x72xf32>
    %123 = vector.extract_strided_slice %3 {offsets = [144, 128], sizes = [8, 72], strides = [1, 1]} : vector<192x256xf32> to vector<8x72xf32>
    %124 = arith.maximumf %122, %123 : vector<8x72xf32>
    %125 = vector.extract_strided_slice %3 {offsets = [152, 0], sizes = [8, 72], strides = [1, 1]} : vector<192x256xf32> to vector<8x72xf32>
    %126 = arith.maximumf %124, %125 : vector<8x72xf32>
    %127 = vector.extract_strided_slice %3 {offsets = [152, 128], sizes = [8, 72], strides = [1, 1]} : vector<192x256xf32> to vector<8x72xf32>
    %128 = arith.maximumf %126, %127 : vector<8x72xf32>
    %129 = vector.broadcast %4 : vector<1x72xf32> to vector<8x72xf32>
    %130 = arith.addf %128, %129 : vector<8x72xf32>
    %cst_25 = arith.constant 0.000000e+00 : f32
    %131 = vector.broadcast %cst_25 : f32 to vector<8x72xf32>
    %132 = arith.maximumf %130, %131 : vector<8x72xf32>
    %133 = arith.truncf %132 : vector<8x72xf32> to vector<8x72xbf16>
    %c72 = arith.constant 72 : index
    %c0_26 = arith.constant 0 : index
    %134 = vector.load %arg13[%c72, %c0_26] : memref<96x72xbf16, #tpu.memory_space<vmem>>, vector<8x72xbf16>
    tpu.vector_store %arg13[%c72, %c0_26], %133 {strides = array<i32>} : memref<96x72xbf16, #tpu.memory_space<vmem>>, vector<8x72xbf16>,
    %135 = vector.extract_strided_slice %3 {offsets = [160, 0], sizes = [8, 72], strides = [1, 1]} : vector<192x256xf32> to vector<8x72xf32>
    %136 = vector.extract_strided_slice %3 {offsets = [160, 128], sizes = [8, 72], strides = [1, 1]} : vector<192x256xf32> to vector<8x72xf32>
    %137 = arith.maximumf %135, %136 : vector<8x72xf32>
    %138 = vector.extract_strided_slice %3 {offsets = [168, 0], sizes = [8, 72], strides = [1, 1]} : vector<192x256xf32> to vector<8x72xf32>
    %139 = arith.maximumf %137, %138 : vector<8x72xf32>
    %140 = vector.extract_strided_slice %3 {offsets = [168, 128], sizes = [8, 72], strides = [1, 1]} : vector<192x256xf32> to vector<8x72xf32>
    %141 = arith.maximumf %139, %140 : vector<8x72xf32>
    %142 = vector.broadcast %4 : vector<1x72xf32> to vector<8x72xf32>
    %143 = arith.addf %141, %142 : vector<8x72xf32>
    %cst_27 = arith.constant 0.000000e+00 : f32
    %144 = vector.broadcast %cst_27 : f32 to vector<8x72xf32>
    %145 = arith.maximumf %143, %144 : vector<8x72xf32>
    %146 = arith.truncf %145 : vector<8x72xf32> to vector<8x72xbf16>
    %c80 = arith.constant 80 : index
    %c0_28 = arith.constant 0 : index
    %147 = vector.load %arg13[%c80, %c0_28] : memref<96x72xbf16, #tpu.memory_space<vmem>>, vector<8x72xbf16>
    tpu.vector_store %arg13[%c80, %c0_28], %146 {strides = array<i32>} : memref<96x72xbf16, #tpu.memory_space<vmem>>, vector<8x72xbf16>,
    %148 = vector.extract_strided_slice %3 {offsets = [176, 0], sizes = [8, 72], strides = [1, 1]} : vector<192x256xf32> to vector<8x72xf32>
    %149 = vector.extract_strided_slice %3 {offsets = [176, 128], sizes = [8, 72], strides = [1, 1]} : vector<192x256xf32> to vector<8x72xf32>
    %150 = arith.maximumf %148, %149 : vector<8x72xf32>
    %151 = vector.extract_strided_slice %3 {offsets = [184, 0], sizes = [8, 72], strides = [1, 1]} : vector<192x256xf32> to vector<8x72xf32>
    %152 = arith.maximumf %150, %151 : vector<8x72xf32>
    %153 = vector.extract_strided_slice %3 {offsets = [184, 128], sizes = [8, 72], strides = [1, 1]} : vector<192x256xf32> to vector<8x72xf32>
    %154 = arith.maximumf %152, %153 : vector<8x72xf32>
    %155 = vector.broadcast %4 : vector<1x72xf32> to vector<8x72xf32>
    %156 = arith.addf %154, %155 : vector<8x72xf32>
    %cst_29 = arith.constant 0.000000e+00 : f32
    %157 = vector.broadcast %cst_29 : f32 to vector<8x72xf32>
    %158 = arith.maximumf %156, %157 : vector<8x72xf32>
    %159 = arith.truncf %158 : vector<8x72xf32> to vector<8x72xbf16>
    %c88 = arith.constant 88 : index
    %c0_30 = arith.constant 0 : index
    %160 = vector.load %arg13[%c88, %c0_30] : memref<96x72xbf16, #tpu.memory_space<vmem>>, vector<8x72xbf16>
    tpu.vector_store %arg13[%c88, %c0_30], %159 {strides = array<i32>} : memref<96x72xbf16, #tpu.memory_space<vmem>>, vector<8x72xbf16>,
    %c0_31 = arith.constant 0 : index
    %c0_32 = arith.constant 0 : index
    %161 = vector.load %arg13[%c0_31, %c0_32] : memref<96x72xbf16, #tpu.memory_space<vmem>>, vector<96x72xbf16>
    %c0_33 = arith.constant 0 : index
    %c0_34 = arith.constant 0 : index
    %162 = vector.load %arg4[%c0_33, %c0_34] : memref<72x1280xbf16, #tpu.memory_space<vmem>>, vector<72x1280xbf16>
    %cst_35 = arith.constant dense<0.000000e+00> : vector<96x1280xf32>
    %163 = tpu.matmul %161, %162, %cst_35 {dimension_numbers = #tpu.dot_dimension_numbers<[1], [0], [0], [1], [0, 0, 1, 1], [], []>} : vector<96x72xbf16>, vector<72x1280xbf16>, vector<96x1280xf32> -> vector<96x1280xf32>
    %c0_36 = arith.constant 0 : index
    %c0_37 = arith.constant 0 : index
    %164 = vector.load %arg5[%c0_36, %c0_37] : memref<1x48xf32, #tpu.memory_space<vmem>>, vector<1x48xf32>
    %165 = vector.extract_strided_slice %163 {offsets = [0, 0], sizes = [8, 48], strides = [1, 1]} : vector<96x1280xf32> to vector<8x48xf32>
    %166 = vector.extract_strided_slice %163 {offsets = [8, 256], sizes = [8, 48], strides = [1, 1]} : vector<96x1280xf32> to vector<8x48xf32>
    %167 = arith.addf %165, %166 : vector<8x48xf32>
    %168 = vector.extract_strided_slice %163 {offsets = [16, 512], sizes = [8, 48], strides = [1, 1]} : vector<96x1280xf32> to vector<8x48xf32>
    %169 = arith.addf %167, %168 : vector<8x48xf32>
    %170 = vector.extract_strided_slice %163 {offsets = [24, 768], sizes = [8, 48], strides = [1, 1]} : vector<96x1280xf32> to vector<8x48xf32>
    %171 = arith.addf %169, %170 : vector<8x48xf32>
    %172 = vector.extract_strided_slice %163 {offsets = [32, 1024], sizes = [8, 48], strides = [1, 1]} : vector<96x1280xf32> to vector<8x48xf32>
    %173 = arith.addf %171, %172 : vector<8x48xf32>
    %174 = vector.extract_strided_slice %163 {offsets = [0, 128], sizes = [8, 48], strides = [1, 1]} : vector<96x1280xf32> to vector<8x48xf32>
    %175 = vector.extract_strided_slice %163 {offsets = [8, 384], sizes = [8, 48], strides = [1, 1]} : vector<96x1280xf32> to vector<8x48xf32>
    %176 = arith.addf %174, %175 : vector<8x48xf32>
    %177 = vector.extract_strided_slice %163 {offsets = [16, 640], sizes = [8, 48], strides = [1, 1]} : vector<96x1280xf32> to vector<8x48xf32>
    %178 = arith.addf %176, %177 : vector<8x48xf32>
    %179 = vector.extract_strided_slice %163 {offsets = [24, 896], sizes = [8, 48], strides = [1, 1]} : vector<96x1280xf32> to vector<8x48xf32>
    %180 = arith.addf %178, %179 : vector<8x48xf32>
    %181 = vector.extract_strided_slice %163 {offsets = [32, 1152], sizes = [8, 48], strides = [1, 1]} : vector<96x1280xf32> to vector<8x48xf32>
    %182 = arith.addf %180, %181 : vector<8x48xf32>
    %183 = arith.maximumf %173, %182 : vector<8x48xf32>
    %184 = vector.extract_strided_slice %163 {offsets = [8, 0], sizes = [8, 48], strides = [1, 1]} : vector<96x1280xf32> to vector<8x48xf32>
    %185 = vector.extract_strided_slice %163 {offsets = [16, 256], sizes = [8, 48], strides = [1, 1]} : vector<96x1280xf32> to vector<8x48xf32>
    %186 = arith.addf %184, %185 : vector<8x48xf32>
    %187 = vector.extract_strided_slice %163 {offsets = [24, 512], sizes = [8, 48], strides = [1, 1]} : vector<96x1280xf32> to vector<8x48xf32>
    %188 = arith.addf %186, %187 : vector<8x48xf32>
    %189 = vector.extract_strided_slice %163 {offsets = [32, 768], sizes = [8, 48], strides = [1, 1]} : vector<96x1280xf32> to vector<8x48xf32>
    %190 = arith.addf %188, %189 : vector<8x48xf32>
    %191 = vector.extract_strided_slice %163 {offsets = [40, 1024], sizes = [8, 48], strides = [1, 1]} : vector<96x1280xf32> to vector<8x48xf32>
    %192 = arith.addf %190, %191 : vector<8x48xf32>
    %193 = arith.maximumf %183, %192 : vector<8x48xf32>
    %194 = vector.extract_strided_slice %163 {offsets = [8, 128], sizes = [8, 48], strides = [1, 1]} : vector<96x1280xf32> to vector<8x48xf32>
    %195 = vector.extract_strided_slice %163 {offsets = [16, 384], sizes = [8, 48], strides = [1, 1]} : vector<96x1280xf32> to vector<8x48xf32>
    %196 = arith.addf %194, %195 : vector<8x48xf32>
    %197 = vector.extract_strided_slice %163 {offsets = [24, 640], sizes = [8, 48], strides = [1, 1]} : vector<96x1280xf32> to vector<8x48xf32>
    %198 = arith.addf %196, %197 : vector<8x48xf32>
    %199 = vector.extract_strided_slice %163 {offsets = [32, 896], sizes = [8, 48], strides = [1, 1]} : vector<96x1280xf32> to vector<8x48xf32>
    %200 = arith.addf %198, %199 : vector<8x48xf32>
    %201 = vector.extract_strided_slice %163 {offsets = [40, 1152], sizes = [8, 48], strides = [1, 1]} : vector<96x1280xf32> to vector<8x48xf32>
    %202 = arith.addf %200, %201 : vector<8x48xf32>
    %203 = arith.maximumf %193, %202 : vector<8x48xf32>
    %204 = vector.broadcast %164 : vector<1x48xf32> to vector<8x48xf32>
    %205 = arith.addf %203, %204 : vector<8x48xf32>
    %cst_38 = arith.constant 0.000000e+00 : f32
    %206 = vector.broadcast %cst_38 : f32 to vector<8x48xf32>
    %207 = arith.maximumf %205, %206 : vector<8x48xf32>
    %208 = arith.truncf %207 : vector<8x48xf32> to vector<8x48xbf16>
    %c0_39 = arith.constant 0 : index
    %c0_40 = arith.constant 0 : index
    %c0_41 = arith.constant 0 : index
    %209 = vector.load %arg6[%c0_39, %c0_40, %c0_41] : memref<4x48x120xbf16, #tpu.memory_space<vmem>>, vector<1x48x120xbf16>
    %210 = vector.shape_cast %209 : vector<1x48x120xbf16> to vector<48x120xbf16>
    %cst_42 = arith.constant dense<0.000000e+00> : vector<8x120xf32>
    %211 = tpu.matmul %208, %210, %cst_42 {dimension_numbers = #tpu.dot_dimension_numbers<[1], [0], [0], [1], [0, 0, 1, 1], [], []>} : vector<8x48xbf16>, vector<48x120xbf16>, vector<8x120xf32> -> vector<8x120xf32>
    %212 = vector.extract_strided_slice %163 {offsets = [16, 0], sizes = [8, 48], strides = [1, 1]} : vector<96x1280xf32> to vector<8x48xf32>
    %213 = vector.extract_strided_slice %163 {offsets = [24, 256], sizes = [8, 48], strides = [1, 1]} : vector<96x1280xf32> to vector<8x48xf32>
    %214 = arith.addf %212, %213 : vector<8x48xf32>
    %215 = vector.extract_strided_slice %163 {offsets = [32, 512], sizes = [8, 48], strides = [1, 1]} : vector<96x1280xf32> to vector<8x48xf32>
    %216 = arith.addf %214, %215 : vector<8x48xf32>
    %217 = vector.extract_strided_slice %163 {offsets = [40, 768], sizes = [8, 48], strides = [1, 1]} : vector<96x1280xf32> to vector<8x48xf32>
    %218 = arith.addf %216, %217 : vector<8x48xf32>
    %219 = vector.extract_strided_slice %163 {offsets = [48, 1024], sizes = [8, 48], strides = [1, 1]} : vector<96x1280xf32> to vector<8x48xf32>
    %220 = arith.addf %218, %219 : vector<8x48xf32>
    %221 = vector.extract_strided_slice %163 {offsets = [16, 128], sizes = [8, 48], strides = [1, 1]} : vector<96x1280xf32> to vector<8x48xf32>
    %222 = vector.extract_strided_slice %163 {offsets = [24, 384], sizes = [8, 48], strides = [1, 1]} : vector<96x1280xf32> to vector<8x48xf32>
    %223 = arith.addf %221, %222 : vector<8x48xf32>
    %224 = vector.extract_strided_slice %163 {offsets = [32, 640], sizes = [8, 48], strides = [1, 1]} : vector<96x1280xf32> to vector<8x48xf32>
    %225 = arith.addf %223, %224 : vector<8x48xf32>
    %226 = vector.extract_strided_slice %163 {offsets = [40, 896], sizes = [8, 48], strides = [1, 1]} : vector<96x1280xf32> to vector<8x48xf32>
    %227 = arith.addf %225, %226 : vector<8x48xf32>
    %228 = vector.extract_strided_slice %163 {offsets = [48, 1152], sizes = [8, 48], strides = [1, 1]} : vector<96x1280xf32> to vector<8x48xf32>
    %229 = arith.addf %227, %228 : vector<8x48xf32>
    %230 = arith.maximumf %220, %229 : vector<8x48xf32>
    %231 = vector.extract_strided_slice %163 {offsets = [24, 0], sizes = [8, 48], strides = [1, 1]} : vector<96x1280xf32> to vector<8x48xf32>
    %232 = vector.extract_strided_slice %163 {offsets = [32, 256], sizes = [8, 48], strides = [1, 1]} : vector<96x1280xf32> to vector<8x48xf32>
    %233 = arith.addf %231, %232 : vector<8x48xf32>
    %234 = vector.extract_strided_slice %163 {offsets = [40, 512], sizes = [8, 48], strides = [1, 1]} : vector<96x1280xf32> to vector<8x48xf32>
    %235 = arith.addf %233, %234 : vector<8x48xf32>
    %236 = vector.extract_strided_slice %163 {offsets = [48, 768], sizes = [8, 48], strides = [1, 1]} : vector<96x1280xf32> to vector<8x48xf32>
    %237 = arith.addf %235, %236 : vector<8x48xf32>
    %238 = vector.extract_strided_slice %163 {offsets = [56, 1024], sizes = [8, 48], strides = [1, 1]} : vector<96x1280xf32> to vector<8x48xf32>
    %239 = arith.addf %237, %238 : vector<8x48xf32>
    %240 = arith.maximumf %230, %239 : vector<8x48xf32>
    %241 = vector.extract_strided_slice %163 {offsets = [24, 128], sizes = [8, 48], strides = [1, 1]} : vector<96x1280xf32> to vector<8x48xf32>
    %242 = vector.extract_strided_slice %163 {offsets = [32, 384], sizes = [8, 48], strides = [1, 1]} : vector<96x1280xf32> to vector<8x48xf32>
    %243 = arith.addf %241, %242 : vector<8x48xf32>
    %244 = vector.extract_strided_slice %163 {offsets = [40, 640], sizes = [8, 48], strides = [1, 1]} : vector<96x1280xf32> to vector<8x48xf32>
    %245 = arith.addf %243, %244 : vector<8x48xf32>
    %246 = vector.extract_strided_slice %163 {offsets = [48, 896], sizes = [8, 48], strides = [1, 1]} : vector<96x1280xf32> to vector<8x48xf32>
    %247 = arith.addf %245, %246 : vector<8x48xf32>
    %248 = vector.extract_strided_slice %163 {offsets = [56, 1152], sizes = [8, 48], strides = [1, 1]} : vector<96x1280xf32> to vector<8x48xf32>
    %249 = arith.addf %247, %248 : vector<8x48xf32>
    %250 = arith.maximumf %240, %249 : vector<8x48xf32>
    %251 = vector.broadcast %164 : vector<1x48xf32> to vector<8x48xf32>
    %252 = arith.addf %250, %251 : vector<8x48xf32>
    %cst_43 = arith.constant 0.000000e+00 : f32
    %253 = vector.broadcast %cst_43 : f32 to vector<8x48xf32>
    %254 = arith.maximumf %252, %253 : vector<8x48xf32>
    %255 = arith.truncf %254 : vector<8x48xf32> to vector<8x48xbf16>
    %c1 = arith.constant 1 : index
    %c0_44 = arith.constant 0 : index
    %c0_45 = arith.constant 0 : index
    %256 = vector.load %arg6[%c1, %c0_44, %c0_45] : memref<4x48x120xbf16, #tpu.memory_space<vmem>>, vector<1x48x120xbf16>
    %257 = vector.shape_cast %256 : vector<1x48x120xbf16> to vector<48x120xbf16>
    %cst_46 = arith.constant dense<0.000000e+00> : vector<8x120xf32>
    %258 = tpu.matmul %255, %257, %cst_46 {dimension_numbers = #tpu.dot_dimension_numbers<[1], [0], [0], [1], [0, 0, 1, 1], [], []>} : vector<8x48xbf16>, vector<48x120xbf16>, vector<8x120xf32> -> vector<8x120xf32>
    %259 = arith.addf %211, %258 : vector<8x120xf32>
    %260 = vector.extract_strided_slice %163 {offsets = [32, 0], sizes = [8, 48], strides = [1, 1]} : vector<96x1280xf32> to vector<8x48xf32>
    %261 = vector.extract_strided_slice %163 {offsets = [40, 256], sizes = [8, 48], strides = [1, 1]} : vector<96x1280xf32> to vector<8x48xf32>
    %262 = arith.addf %260, %261 : vector<8x48xf32>
    %263 = vector.extract_strided_slice %163 {offsets = [48, 512], sizes = [8, 48], strides = [1, 1]} : vector<96x1280xf32> to vector<8x48xf32>
    %264 = arith.addf %262, %263 : vector<8x48xf32>
    %265 = vector.extract_strided_slice %163 {offsets = [56, 768], sizes = [8, 48], strides = [1, 1]} : vector<96x1280xf32> to vector<8x48xf32>
    %266 = arith.addf %264, %265 : vector<8x48xf32>
    %267 = vector.extract_strided_slice %163 {offsets = [64, 1024], sizes = [8, 48], strides = [1, 1]} : vector<96x1280xf32> to vector<8x48xf32>
    %268 = arith.addf %266, %267 : vector<8x48xf32>
    %269 = vector.extract_strided_slice %163 {offsets = [32, 128], sizes = [8, 48], strides = [1, 1]} : vector<96x1280xf32> to vector<8x48xf32>
    %270 = vector.extract_strided_slice %163 {offsets = [40, 384], sizes = [8, 48], strides = [1, 1]} : vector<96x1280xf32> to vector<8x48xf32>
    %271 = arith.addf %269, %270 : vector<8x48xf32>
    %272 = vector.extract_strided_slice %163 {offsets = [48, 640], sizes = [8, 48], strides = [1, 1]} : vector<96x1280xf32> to vector<8x48xf32>
    %273 = arith.addf %271, %272 : vector<8x48xf32>
    %274 = vector.extract_strided_slice %163 {offsets = [56, 896], sizes = [8, 48], strides = [1, 1]} : vector<96x1280xf32> to vector<8x48xf32>
    %275 = arith.addf %273, %274 : vector<8x48xf32>
    %276 = vector.extract_strided_slice %163 {offsets = [64, 1152], sizes = [8, 48], strides = [1, 1]} : vector<96x1280xf32> to vector<8x48xf32>
    %277 = arith.addf %275, %276 : vector<8x48xf32>
    %278 = arith.maximumf %268, %277 : vector<8x48xf32>
    %279 = vector.extract_strided_slice %163 {offsets = [40, 0], sizes = [8, 48], strides = [1, 1]} : vector<96x1280xf32> to vector<8x48xf32>
    %280 = vector.extract_strided_slice %163 {offsets = [48, 256], sizes = [8, 48], strides = [1, 1]} : vector<96x1280xf32> to vector<8x48xf32>
    %281 = arith.addf %279, %280 : vector<8x48xf32>
    %282 = vector.extract_strided_slice %163 {offsets = [56, 512], sizes = [8, 48], strides = [1, 1]} : vector<96x1280xf32> to vector<8x48xf32>
    %283 = arith.addf %281, %282 : vector<8x48xf32>
    %284 = vector.extract_strided_slice %163 {offsets = [64, 768], sizes = [8, 48], strides = [1, 1]} : vector<96x1280xf32> to vector<8x48xf32>
    %285 = arith.addf %283, %284 : vector<8x48xf32>
    %286 = vector.extract_strided_slice %163 {offsets = [72, 1024], sizes = [8, 48], strides = [1, 1]} : vector<96x1280xf32> to vector<8x48xf32>
    %287 = arith.addf %285, %286 : vector<8x48xf32>
    %288 = arith.maximumf %278, %287 : vector<8x48xf32>
    %289 = vector.extract_strided_slice %163 {offsets = [40, 128], sizes = [8, 48], strides = [1, 1]} : vector<96x1280xf32> to vector<8x48xf32>
    %290 = vector.extract_strided_slice %163 {offsets = [48, 384], sizes = [8, 48], strides = [1, 1]} : vector<96x1280xf32> to vector<8x48xf32>
    %291 = arith.addf %289, %290 : vector<8x48xf32>
    %292 = vector.extract_strided_slice %163 {offsets = [56, 640], sizes = [8, 48], strides = [1, 1]} : vector<96x1280xf32> to vector<8x48xf32>
    %293 = arith.addf %291, %292 : vector<8x48xf32>
    %294 = vector.extract_strided_slice %163 {offsets = [64, 896], sizes = [8, 48], strides = [1, 1]} : vector<96x1280xf32> to vector<8x48xf32>
    %295 = arith.addf %293, %294 : vector<8x48xf32>
    %296 = vector.extract_strided_slice %163 {offsets = [72, 1152], sizes = [8, 48], strides = [1, 1]} : vector<96x1280xf32> to vector<8x48xf32>
    %297 = arith.addf %295, %296 : vector<8x48xf32>
    %298 = arith.maximumf %288, %297 : vector<8x48xf32>
    %299 = vector.broadcast %164 : vector<1x48xf32> to vector<8x48xf32>
    %300 = arith.addf %298, %299 : vector<8x48xf32>
    %cst_47 = arith.constant 0.000000e+00 : f32
    %301 = vector.broadcast %cst_47 : f32 to vector<8x48xf32>
    %302 = arith.maximumf %300, %301 : vector<8x48xf32>
    %303 = arith.truncf %302 : vector<8x48xf32> to vector<8x48xbf16>
    %c2 = arith.constant 2 : index
    %c0_48 = arith.constant 0 : index
    %c0_49 = arith.constant 0 : index
    %304 = vector.load %arg6[%c2, %c0_48, %c0_49] : memref<4x48x120xbf16, #tpu.memory_space<vmem>>, vector<1x48x120xbf16>
    %305 = vector.shape_cast %304 : vector<1x48x120xbf16> to vector<48x120xbf16>
    %cst_50 = arith.constant dense<0.000000e+00> : vector<8x120xf32>
    %306 = tpu.matmul %303, %305, %cst_50 {dimension_numbers = #tpu.dot_dimension_numbers<[1], [0], [0], [1], [0, 0, 1, 1], [], []>} : vector<8x48xbf16>, vector<48x120xbf16>, vector<8x120xf32> -> vector<8x120xf32>
    %307 = arith.addf %259, %306 : vector<8x120xf32>
    %308 = vector.extract_strided_slice %163 {offsets = [48, 0], sizes = [8, 48], strides = [1, 1]} : vector<96x1280xf32> to vector<8x48xf32>
    %309 = vector.extract_strided_slice %163 {offsets = [56, 256], sizes = [8, 48], strides = [1, 1]} : vector<96x1280xf32> to vector<8x48xf32>
    %310 = arith.addf %308, %309 : vector<8x48xf32>
    %311 = vector.extract_strided_slice %163 {offsets = [64, 512], sizes = [8, 48], strides = [1, 1]} : vector<96x1280xf32> to vector<8x48xf32>
    %312 = arith.addf %310, %311 : vector<8x48xf32>
    %313 = vector.extract_strided_slice %163 {offsets = [72, 768], sizes = [8, 48], strides = [1, 1]} : vector<96x1280xf32> to vector<8x48xf32>
    %314 = arith.addf %312, %313 : vector<8x48xf32>
    %315 = vector.extract_strided_slice %163 {offsets = [80, 1024], sizes = [8, 48], strides = [1, 1]} : vector<96x1280xf32> to vector<8x48xf32>
    %316 = arith.addf %314, %315 : vector<8x48xf32>
    %317 = vector.extract_strided_slice %163 {offsets = [48, 128], sizes = [8, 48], strides = [1, 1]} : vector<96x1280xf32> to vector<8x48xf32>
    %318 = vector.extract_strided_slice %163 {offsets = [56, 384], sizes = [8, 48], strides = [1, 1]} : vector<96x1280xf32> to vector<8x48xf32>
    %319 = arith.addf %317, %318 : vector<8x48xf32>
    %320 = vector.extract_strided_slice %163 {offsets = [64, 640], sizes = [8, 48], strides = [1, 1]} : vector<96x1280xf32> to vector<8x48xf32>
    %321 = arith.addf %319, %320 : vector<8x48xf32>
    %322 = vector.extract_strided_slice %163 {offsets = [72, 896], sizes = [8, 48], strides = [1, 1]} : vector<96x1280xf32> to vector<8x48xf32>
    %323 = arith.addf %321, %322 : vector<8x48xf32>
    %324 = vector.extract_strided_slice %163 {offsets = [80, 1152], sizes = [8, 48], strides = [1, 1]} : vector<96x1280xf32> to vector<8x48xf32>
    %325 = arith.addf %323, %324 : vector<8x48xf32>
    %326 = arith.maximumf %316, %325 : vector<8x48xf32>
    %327 = vector.extract_strided_slice %163 {offsets = [56, 0], sizes = [8, 48], strides = [1, 1]} : vector<96x1280xf32> to vector<8x48xf32>
    %328 = vector.extract_strided_slice %163 {offsets = [64, 256], sizes = [8, 48], strides = [1, 1]} : vector<96x1280xf32> to vector<8x48xf32>
    %329 = arith.addf %327, %328 : vector<8x48xf32>
    %330 = vector.extract_strided_slice %163 {offsets = [72, 512], sizes = [8, 48], strides = [1, 1]} : vector<96x1280xf32> to vector<8x48xf32>
    %331 = arith.addf %329, %330 : vector<8x48xf32>
    %332 = vector.extract_strided_slice %163 {offsets = [80, 768], sizes = [8, 48], strides = [1, 1]} : vector<96x1280xf32> to vector<8x48xf32>
    %333 = arith.addf %331, %332 : vector<8x48xf32>
    %334 = vector.extract_strided_slice %163 {offsets = [88, 1024], sizes = [8, 48], strides = [1, 1]} : vector<96x1280xf32> to vector<8x48xf32>
    %335 = arith.addf %333, %334 : vector<8x48xf32>
    %336 = arith.maximumf %326, %335 : vector<8x48xf32>
    %337 = vector.extract_strided_slice %163 {offsets = [56, 128], sizes = [8, 48], strides = [1, 1]} : vector<96x1280xf32> to vector<8x48xf32>
    %338 = vector.extract_strided_slice %163 {offsets = [64, 384], sizes = [8, 48], strides = [1, 1]} : vector<96x1280xf32> to vector<8x48xf32>
    %339 = arith.addf %337, %338 : vector<8x48xf32>
    %340 = vector.extract_strided_slice %163 {offsets = [72, 640], sizes = [8, 48], strides = [1, 1]} : vector<96x1280xf32> to vector<8x48xf32>
    %341 = arith.addf %339, %340 : vector<8x48xf32>
    %342 = vector.extract_strided_slice %163 {offsets = [80, 896], sizes = [8, 48], strides = [1, 1]} : vector<96x1280xf32> to vector<8x48xf32>
    %343 = arith.addf %341, %342 : vector<8x48xf32>
    %344 = vector.extract_strided_slice %163 {offsets = [88, 1152], sizes = [8, 48], strides = [1, 1]} : vector<96x1280xf32> to vector<8x48xf32>
    %345 = arith.addf %343, %344 : vector<8x48xf32>
    %346 = arith.maximumf %336, %345 : vector<8x48xf32>
    %347 = vector.broadcast %164 : vector<1x48xf32> to vector<8x48xf32>
    %348 = arith.addf %346, %347 : vector<8x48xf32>
    %cst_51 = arith.constant 0.000000e+00 : f32
    %349 = vector.broadcast %cst_51 : f32 to vector<8x48xf32>
    %350 = arith.maximumf %348, %349 : vector<8x48xf32>
    %351 = arith.truncf %350 : vector<8x48xf32> to vector<8x48xbf16>
    %c3 = arith.constant 3 : index
    %c0_52 = arith.constant 0 : index
    %c0_53 = arith.constant 0 : index
    %352 = vector.load %arg6[%c3, %c0_52, %c0_53] : memref<4x48x120xbf16, #tpu.memory_space<vmem>>, vector<1x48x120xbf16>
    %353 = vector.shape_cast %352 : vector<1x48x120xbf16> to vector<48x120xbf16>
    %cst_54 = arith.constant dense<0.000000e+00> : vector<8x120xf32>
    %354 = tpu.matmul %351, %353, %cst_54 {dimension_numbers = #tpu.dot_dimension_numbers<[1], [0], [0], [1], [0, 0, 1, 1], [], []>} : vector<8x48xbf16>, vector<48x120xbf16>, vector<8x120xf32> -> vector<8x120xf32>
    %355 = arith.addf %307, %354 : vector<8x120xf32>
    %c0_55 = arith.constant 0 : index
    %c0_56 = arith.constant 0 : index
    %356 = vector.load %arg7[%c0_55, %c0_56] : memref<1x120xf32, #tpu.memory_space<vmem>>, vector<1x120xf32>
    %357 = vector.broadcast %356 : vector<1x120xf32> to vector<8x120xf32>
    %358 = arith.addf %355, %357 : vector<8x120xf32>
    %cst_57 = arith.constant 0.000000e+00 : f32
    %359 = vector.broadcast %cst_57 : f32 to vector<8x120xf32>
    %360 = arith.maximumf %358, %359 : vector<8x120xf32>
    %361 = arith.truncf %360 : vector<8x120xf32> to vector<8x120xbf16>
    %c0_58 = arith.constant 0 : index
    %c0_59 = arith.constant 0 : index
    %362 = vector.load %arg8[%c0_58, %c0_59] : memref<120x60xbf16, #tpu.memory_space<vmem>>, vector<120x60xbf16>
    %cst_60 = arith.constant dense<0.000000e+00> : vector<8x60xf32>
    %363 = tpu.matmul %361, %362, %cst_60 {dimension_numbers = #tpu.dot_dimension_numbers<[1], [0], [0], [1], [0, 0, 1, 1], [], []>} : vector<8x120xbf16>, vector<120x60xbf16>, vector<8x60xf32> -> vector<8x60xf32>
    %c0_61 = arith.constant 0 : index
    %c0_62 = arith.constant 0 : index
    %364 = vector.load %arg9[%c0_61, %c0_62] : memref<1x60xf32, #tpu.memory_space<vmem>>, vector<1x60xf32>
    %365 = vector.broadcast %364 : vector<1x60xf32> to vector<8x60xf32>
    %366 = arith.addf %363, %365 : vector<8x60xf32>
    %cst_63 = arith.constant 0.000000e+00 : f32
    %367 = vector.broadcast %cst_63 : f32 to vector<8x60xf32>
    %368 = arith.maximumf %366, %367 : vector<8x60xf32>
    %369 = arith.truncf %368 : vector<8x60xf32> to vector<8x60xbf16>
    %c0_64 = arith.constant 0 : index
    %c0_65 = arith.constant 0 : index
    %370 = vector.load %arg10[%c0_64, %c0_65] : memref<60x128xbf16, #tpu.memory_space<vmem>>, vector<60x128xbf16>
    %cst_66 = arith.constant dense<0.000000e+00> : vector<8x128xf32>
    %371 = tpu.matmul %369, %370, %cst_66 {dimension_numbers = #tpu.dot_dimension_numbers<[1], [0], [0], [1], [0, 0, 1, 1], [], []>} : vector<8x60xbf16>, vector<60x128xbf16>, vector<8x128xf32> -> vector<8x128xf32>
    %c0_67 = arith.constant 0 : index
    %c0_68 = arith.constant 0 : index
    %372 = vector.load %arg11[%c0_67, %c0_68] : memref<1x128xf32, #tpu.memory_space<vmem>>, vector<1x128xf32>
    %373 = vector.broadcast %372 : vector<1x128xf32> to vector<8x128xf32>
    %374 = arith.addf %371, %373 : vector<8x128xf32>
    %c0_69 = arith.constant 0 : index
    %c0_70 = arith.constant 0 : index
    %375 = vector.load %arg12[%c0_69, %c0_70] : memref<8x128xf32, #tpu.memory_space<vmem>>, vector<8x128xf32>
    tpu.vector_store %arg12[%c0_69, %c0_70], %374 {strides = array<i32>} : memref<8x128xf32, #tpu.memory_space<vmem>>, vector<8x128xf32>,
    return
  }
  func.func @transform_0(%arg0: i32) -> (i32, i32, i32) {
    %c0_i32 = arith.constant 0 : i32
    %c0_i32_0 = arith.constant 0 : i32
    %c0_i32_1 = arith.constant 0 : i32
    return %c0_i32, %arg0, %c0_i32_0 : i32, i32, i32
  }
  func.func @transform_1(%arg0: i32) -> (i32, i32) {
    %c0_i32 = arith.constant 0 : i32
    %c0_i32_0 = arith.constant 0 : i32
    %c0_i32_1 = arith.constant 0 : i32
    return %c0_i32, %c0_i32_0 : i32, i32
  }
  func.func @transform_2(%arg0: i32) -> (i32, i32) {
    %c0_i32 = arith.constant 0 : i32
    %c0_i32_0 = arith.constant 0 : i32
    %c0_i32_1 = arith.constant 0 : i32
    return %c0_i32, %c0_i32_0 : i32, i32
  }
  func.func @transform_3(%arg0: i32) -> (i32, i32) {
    %c0_i32 = arith.constant 0 : i32
    %c0_i32_0 = arith.constant 0 : i32
    %c0_i32_1 = arith.constant 0 : i32
    return %c0_i32, %c0_i32_0 : i32, i32
  }
  func.func @transform_4(%arg0: i32) -> (i32, i32) {
    %c0_i32 = arith.constant 0 : i32
    %c0_i32_0 = arith.constant 0 : i32
    %c0_i32_1 = arith.constant 0 : i32
    return %c0_i32, %c0_i32_0 : i32, i32
  }
  func.func @transform_5(%arg0: i32) -> (i32, i32, i32) {
    %c0_i32 = arith.constant 0 : i32
    %c0_i32_0 = arith.constant 0 : i32
    %c0_i32_1 = arith.constant 0 : i32
    %c0_i32_2 = arith.constant 0 : i32
    return %c0_i32, %c0_i32_0, %c0_i32_1 : i32, i32, i32
  }
  func.func @transform_6(%arg0: i32) -> (i32, i32) {
    %c0_i32 = arith.constant 0 : i32
    %c0_i32_0 = arith.constant 0 : i32
    %c0_i32_1 = arith.constant 0 : i32
    return %c0_i32, %c0_i32_0 : i32, i32
  }
  func.func @transform_7(%arg0: i32) -> (i32, i32) {
    %c0_i32 = arith.constant 0 : i32
    %c0_i32_0 = arith.constant 0 : i32
    %c0_i32_1 = arith.constant 0 : i32
    return %c0_i32, %c0_i32_0 : i32, i32
  }
  func.func @transform_8(%arg0: i32) -> (i32, i32) {
    %c0_i32 = arith.constant 0 : i32
    %c0_i32_0 = arith.constant 0 : i32
    %c0_i32_1 = arith.constant 0 : i32
    return %c0_i32, %c0_i32_0 : i32, i32
  }
  func.func @transform_9(%arg0: i32) -> (i32, i32) {
    %c0_i32 = arith.constant 0 : i32
    %c0_i32_0 = arith.constant 0 : i32
    %c0_i32_1 = arith.constant 0 : i32
    return %c0_i32, %c0_i32_0 : i32, i32
  }
  func.func @transform_10(%arg0: i32) -> (i32, i32) {
    %c0_i32 = arith.constant 0 : i32
    %c0_i32_0 = arith.constant 0 : i32
    %c0_i32_1 = arith.constant 0 : i32
    return %c0_i32, %c0_i32_0 : i32, i32
  }
  func.func @transform_11(%arg0: i32) -> (i32, i32) {
    %c0_i32 = arith.constant 0 : i32
    %c0_i32_0 = arith.constant 0 : i32
    return %arg0, %c0_i32 : i32, i32
  }
}

</mosaic_0001>

<bundles_post_ra>
// kernel: network_forward.1
= control target key start
LH: loop header
LB: loop body
LE: loop exit
PB: predicated region body
PF: predicated region fallthrough
CT: control target
= control target key end

     0   :  { %vm314_vm0 = vcmask 1045504   ;;  %vm277_vm1 = vcmask 97280   ;;  %vm1017_vm2 = vcmask 1043456   ;;  %vm607_vm3 = vcmask 584704   ;;  %s3496_s1 = inlined_call_operand.vmem [shape: bf16[140,256], index: 1, kind: input, shape index: {}]   ;;  %s3497_s0 = inlined_call_operand.vmem [shape: bf16[24,8,140], index: 0, kind: input, shape index: {}]   ;;  %s3498_s2 = inlined_call_operand.vmem [shape: f32[1,72], index: 2, kind: input, shape index: {}]   ;;  %s3499_s3 = inlined_call_operand.vmem [shape: bf16[72,1280], index: 3, kind: input, shape index: {}]   ;;  %s3500_s4 = inlined_call_operand.vmem [shape: f32[1,48], index: 4, kind: input, shape index: {}]   ;;  %s3501_s5 = inlined_call_operand.vmem [shape: bf16[4,48,120], index: 5, kind: input, shape index: {}]   ;;  %s3502_s6 = inlined_call_operand.vmem [shape: f32[1,120], index: 6, kind: input, shape index: {}]   ;;  %s3503_s8 = inlined_call_operand.vmem [shape: f32[1,60], index: 8, kind: input, shape index: {}]   ;;  %s3504_s7 = inlined_call_operand.vmem [shape: bf16[120,60], index: 7, kind: input, shape index: {}]   ;;  %s3505_s9 = inlined_call_operand.vmem [shape: bf16[60,128], index: 9, kind: input, shape index: {}]   ;;  %s3506_s10 = inlined_call_operand.vmem [shape: f32[1,128], index: 10, kind: input, shape index: {}]   ;;  %s3507_s11 = inlined_call_operand.vmem [shape: f32[8,128], index: 11, kind: output, shape index: {}]  }
   0x1   :  { %v1963_v0 = vld [vmem:[%s3496_s1 + $0x70] sm:$0xf]  ;;  %v2400_v1 = vld [vmem:[%s3496_s1 + $0x74] sm:$0xf0]  ;;  %v2399_v2 = vld [vmem:[%s3496_s1 + $0x74] sm:$0xf] }
   0x2   :  { %v1964_v3 = vor.u32 %v2400_v1, %v1963_v0  ;;  %v1965_v4 = vld [vmem:[%s3496_s1 + $0x78] sm:$0xf0]  ;;  %v1955_v5 = vld [vmem:[%s3496_s1 + $0x60] sm:$0xf]  ;;  %v2398_v6 = vld [vmem:[%s3496_s1 + $0x64] sm:$0xf0] }
   0x3   :  { %v1968_v7 = vor.u32 %v2399_v2, %v1965_v4  ;;  %v2397_v8 = vld [vmem:[%s3496_s1 + $0x64] sm:$0xf]  ;;  %v1957_v9 = vld [vmem:[%s3496_s1 + $0x68] sm:$0xf0]  ;;  %v1956_v10 = vor.u32 %v2398_v6, %v1955_v5  ;;  %v1947_v12 = vld [vmem:[%s3496_s1 + $0x50] sm:$0xf] }
   0x4   :  { %321 = vmatpush.bf16.msra.mxu0 %v1964_v3  ;;  %v1960_v11 = vor.u32 %v2397_v8, %v1957_v9  ;;  %v2396_v13 = vld [vmem:[%s3496_s1 + $0x54] sm:$0xf0]  ;;  %v1971_v14 = vld [vmem:[%s3496_s1 + $0x80] sm:$0xf]  ;;  %v2395_v15 = vld [vmem:[%s3496_s1 + $0x54] sm:$0xf] }
   0x5   :  { %459 = vmatpush.bf16.msra.mxu2 %v1968_v7  ;;  %v1949_v16 = vld [vmem:[%s3496_s1 + $0x58] sm:$0xf0]  ;;  %v2402_v17 = vld [vmem:[%s3496_s1 + $0x84] sm:$0x30]  ;;  %v2401_v19 = vld [vmem:[%s3496_s1 + $0x84] sm:$0xf]  ;;  %v1948_v22 = vor.u32 %v2396_v13, %v1947_v12 }
   0x6   :  { %v1972_v18 = vor.u32 %v2402_v17, %v1971_v14  ;;  %v1973_v20 = vld [vmem:[%s3496_s1 + $0x88] sm:$0x30]  ;;  %v2361_v21 = vld [vmem:[%s3497_s0 + $0x4] sm:$0xf]  ;;  %v1952_v25 = vor.u32 %v2395_v15, %v1949_v16  ;;  %v1939_v26 = vld [vmem:[%s3496_s1 + $0x40] sm:$0xf] }
   0x7   :  { %v1976_v23 = vor.u32 %v2401_v19, %v1973_v20  ;;  %v1813_v24 = vld [vmem:[%s3497_s0 + $0x8] sm:$0xf0]  ;;  %v2394_v27 = vld [vmem:[%s3496_s1 + $0x44] sm:$0xf0]  ;;  %v2393_v30 = vld [vmem:[%s3496_s1 + $0x44] sm:$0xf] }
   0x8   :  { %322 = vmatpush.bf16.msra.mxu0 %v1956_v10  ;;  %v316_v28 = vsel %vm314_vm0, %v1972_v18, 0  ;;  %v1816_v29 = vor.u32 %v2361_v21, %v1813_v24  ;;  %v1941_v31 = vld [vmem:[%s3496_s1 + $0x48] sm:$0xf0]  ;;  %v1940_v33 = vor.u32 %v2394_v27, %v1939_v26  ;;  %v1931_v35 = vld [vmem:[%s3496_s1 + $0x30] sm:$0xf]  ;;  %v738_v13 = vld [vmem:[%s3499_s3 + $0x140] sm:$0xff] }
   0x9   :  { %460 = vmatpush.bf16.msra.mxu2 %v1960_v11  ;;  %397 = vmatpush.bf16.msra.mxu1 %v316_v28  ;;  %v319_v32 = vsel %vm314_vm0, %v1976_v23, 0  ;;  %v1944_v34 = vor.u32 %v2393_v30, %v1941_v31  ;;  %v2392_v36 = vld [vmem:[%s3496_s1 + $0x34] sm:$0xf0]  ;;  %v2391_v37 = vld [vmem:[%s3496_s1 + $0x34] sm:$0xf]  ;;  %v899_v14 = vunpack.c.h.b16 %v738_v13  ;;  %v898_v15 = vunpack.c.l.b16 %v738_v13 }
   0xa   :  { %535 = vmatpush.bf16.msra.mxu3 %v319_v32  ;;  %v1933_v38 = vld [vmem:[%s3496_s1 + $0x38] sm:$0xf0]  ;;  %v1932_v39 = vor.u32 %v2392_v36, %v1931_v35  ;;  %v1923_v41 = vld [vmem:[%s3496_s1 + $0x20] sm:$0xf]  ;;  %v2390_v42 = vld [vmem:[%s3496_s1 + $0x24] sm:$0xf0] }
   0xb   :  { %v1936_v40 = vor.u32 %v2391_v37, %v1933_v38  ;;  %v2389_v43 = vld [vmem:[%s3496_s1 + $0x24] sm:$0xf]  ;;  %v1925_v44 = vld [vmem:[%s3496_s1 + $0x28] sm:$0xf0]  ;;  %v1924_v45 = vor.u32 %v2390_v42, %v1923_v41  ;;  %v1915_v47 = vld [vmem:[%s3496_s1 + $0x10] sm:$0xf]  ;;  %v949_v18 = vpack.c.b16 %v899_v14, %v899_v14  ;;  %v948_v19 = vpack.c.b16 %v898_v15, %v898_v15 }
   0xc   :  { %323 = vmatpush.bf16.msra.mxu0 %v1948_v22  ;;  %1977 = vmatmul.msk.bf16.vlgmr.msra.gmra.mxu1 %vm277_vm1, %v1816_v29  ;;  %v1928_v46 = vor.u32 %v2389_v43, %v1925_v44  ;;  %v2388_v48 = vld [vmem:[%s3496_s1 + $0x14] sm:$0xf0]  ;;  %v2387_v49 = vld [vmem:[%s3496_s1 + $0x14] sm:$0xf]  ;;  %v1917_v50 = vld [vmem:[%s3496_s1 + $0x18] sm:$0xf0] }
   0xd   :  { %461 = vmatpush.bf16.msra.mxu2 %v1952_v25  ;;  %1989 = vmatmul.msk.bf16.vlgmr.msra.gmra.mxu3 %vm277_vm1, %v1816_v29  ;;  %v2363_v51 = vld [vmem:[%s3497_s0 + $0x14] sm:$0xf]  ;;  %v1821_v52 = vld [vmem:[%s3497_s0 + $0x18] sm:$0xf0]  ;;  %v1916_v53 = vor.u32 %v2388_v48, %v1915_v47  ;;  %v1920_v54 = vor.u32 %v2387_v49, %v1917_v50  ;;  %v1907_v55 = vld [vmem:[%s3496_s1] sm:$0xf] }
   0xe   :  { %v2386_v56 = vld [vmem:[%s3496_s1 + $0x4] sm:$0xf0]  ;;  %v1824_v57 = vor.u32 %v2363_v51, %v1821_v52  ;;  %v2385_v58 = vld [vmem:[%s3496_s1 + $0x4] sm:$0xf]  ;;  %v1909_v59 = vld [vmem:[%s3496_s1 + $0x8] sm:$0xf0] }
   0xf   :  { %v1908_v60 = vor.u32 %v2386_v56, %v1907_v55  ;;  %v1811_v61 = vld [vmem:[%s3497_s0] sm:$0xf]  ;;  %v2362_v62 = vld [vmem:[%s3497_s0 + $0x4] sm:$0xf0]  ;;  %v1912_v63 = vor.u32 %v2385_v58, %v1909_v59  ;;  %v2365_v1 = vld [vmem:[%s3497_s0 + $0x24] sm:$0xf] }
  0x10   :  { %324 = vmatpush.bf16.msra.mxu0 %v1940_v33  ;;  %v1812_v0 = vor.u32 %v2362_v62, %v1811_v61  ;;  %v1829_v2 = vld [vmem:[%s3497_s0 + $0x28] sm:$0xf0]  ;;  %v1819_v4 = vld [vmem:[%s3497_s0 + $0x10] sm:$0xf]  ;;  %v2364_v5 = vld [vmem:[%s3497_s0 + $0x14] sm:$0xf0] }
  0x11   :  { %462 = vmatpush.bf16.msra.mxu2 %v1944_v34  ;;  %v1832_v3 = vor.u32 %v2365_v1, %v1829_v2  ;;  %v1820_v6 = vor.u32 %v2364_v5, %v1819_v4  ;;  %v2367_v7 = vld [vmem:[%s3497_s0 + $0x34] sm:$0xf]  ;;  %v1837_v8 = vld [vmem:[%s3497_s0 + $0x38] sm:$0xf0]  ;;  %v1827_v10 = vld [vmem:[%s3497_s0 + $0x20] sm:$0xf] }
  0x12   :  { %v1840_v9 = vor.u32 %v2367_v7, %v1837_v8  ;;  %v2366_v11 = vld [vmem:[%s3497_s0 + $0x24] sm:$0xf0]  ;;  %v2369_v16 = vld [vmem:[%s3497_s0 + $0x44] sm:$0xf]  ;;  %v1845_v17 = vld [vmem:[%s3497_s0 + $0x48] sm:$0xf0] }
  0x13   :  { %v1828_v12 = vor.u32 %v2366_v11, %v1827_v10  ;;  %v1848_v20 = vor.u32 %v2369_v16, %v1845_v17  ;;  %v1022_v21 = vsel %vm1017_vm2, %v949_v18, 0  ;;  %v1019_v22 = vsel %vm1017_vm2, %v948_v19, 0  ;;  %v1835_v23 = vld [vmem:[%s3497_s0 + $0x30] sm:$0xf]  ;;  %v2368_v24 = vld [vmem:[%s3497_s0 + $0x34] sm:$0xf0] }
  0x14   :  { %325 = vmatpush.bf16.msra.mxu0 %v1932_v39  ;;  %1086 = vmatpush.bf16.msrb.mxu3 %v1022_v21  ;;  %v1836_v25 = vor.u32 %v2368_v24, %v1835_v23  ;;  %v2371_v26 = vld [vmem:[%s3497_s0 + $0x54] sm:$0xf]  ;;  %v1853_v27 = vld [vmem:[%s3497_s0 + $0x58] sm:$0xf0]  ;;  %v1843_v29 = vld [vmem:[%s3497_s0 + $0x40] sm:$0xf] }
  0x15   :  { %463 = vmatpush.bf16.msra.mxu2 %v1936_v40  ;;  %1051 = vmatpush.bf16.msrb.mxu1 %v1019_v22  ;;  %v1856_v28 = vor.u32 %v2371_v26, %v1853_v27  ;;  %v2370_v30 = vld [vmem:[%s3497_s0 + $0x44] sm:$0xf0]  ;;  %v2439_v32 = vld [vmem:[%s3499_s3 + $0xf4] sm:$0xf]  ;;  %v2149_v33 = vld [vmem:[%s3499_s3 + $0x118] sm:$0xf0] }
  0x16   :  { %v1844_v31 = vor.u32 %v2370_v30, %v1843_v29  ;;  %v2147_v34 = vld [vmem:[%s3499_s3 + $0xf0] sm:$0xf]  ;;  %v2152_v35 = vor.u32 %v2439_v32, %v2149_v33  ;;  %v2444_v36 = vld [vmem:[%s3499_s3 + $0x114] sm:$0xf0]  ;;  %v2373_v37 = vld [vmem:[%s3497_s0 + $0x64] sm:$0xf] }
  0x17   :  { %v1861_v38 = vld [vmem:[%s3497_s0 + $0x68] sm:$0xf0]  ;;  %v2148_v39 = vor.u32 %v2444_v36, %v2147_v34  ;;  %v1851_v41 = vld [vmem:[%s3497_s0 + $0x50] sm:$0xf]  ;;  %v2372_v42 = vld [vmem:[%s3497_s0 + $0x54] sm:$0xf0] }
  0x18   :  { %326 = vmatpush.bf16.msra.mxu0 %v1924_v45  ;;  %1087 = vmatpush.bf16.msrb.mxu3 %v2152_v35  ;;  %v1864_v40 = vor.u32 %v2373_v37, %v1861_v38  ;;  %v1852_v43 = vor.u32 %v2372_v42, %v1851_v41  ;;  %v2375_v44 = vld [vmem:[%s3497_s0 + $0x74] sm:$0xf]  ;;  %v1869_v45 = vld [vmem:[%s3497_s0 + $0x78] sm:$0xf0]  ;;  %v1859_v47 = vld [vmem:[%s3497_s0 + $0x60] sm:$0xf] }
  0x19   :  { %464 = vmatpush.bf16.msra.mxu2 %v1928_v46  ;;  %1052 = vmatpush.bf16.msrb.mxu1 %v2148_v39  ;;  %v1872_v46 = vor.u32 %v2375_v44, %v1869_v45  ;;  %v2374_v48 = vld [vmem:[%s3497_s0 + $0x64] sm:$0xf0]  ;;  %v2377_v50 = vld [vmem:[%s3497_s0 + $0x84] sm:$0xf]  ;;  %v1877_v51 = vld [vmem:[%s3497_s0 + $0x88] sm:$0xf0] }
  0x1a   :  { %v1860_v49 = vor.u32 %v2374_v48, %v1859_v47  ;;  %v1880_v52 = vor.u32 %v2377_v50, %v1877_v51  ;;  %v2376_v55 = vld [vmem:[%s3497_s0 + $0x74] sm:$0xf0]  ;;  %v2379_v59 = vld [vmem:[%s3497_s0 + $0x94] sm:$0xf]  ;;  %v2378_v1 = vld [vmem:[%s3497_s0 + $0x84] sm:$0xf0] }
  0x1b   :  { %v2429_v5 = vld [vmem:[%s3499_s3 + $0xa4] sm:$0xf]  ;;  %v2107_v7 = vld [vmem:[%s3499_s3 + $0xa0] sm:$0xf]  ;;  %v2434_v10 = vld [vmem:[%s3499_s3 + $0xc4] sm:$0xf0] }
  0x1c   :  { %327 = vmatpush.bf16.msra.mxu0 %v1916_v53  ;;  %1978 = vmatmul.msk.bf16.gmra.mxu1 %vm277_vm1, %v1824_v57  ;;  %v2108_v11 = vor.u32 %v2434_v10, %v2107_v7  ;;  %v1893_v13 = vld [vmem:[%s3497_s0 + $0xa8] sm:$0xf0]  ;;  %v2067_v21 = vld [vmem:[%s3499_s3 + $0x50] sm:$0xf]  ;;  %v2424_v22 = vld [vmem:[%s3499_s3 + $0x74] sm:$0xf0] }
  0x1d   :  { %465 = vmatpush.bf16.msra.mxu2 %v1920_v54  ;;  %1990 = vmatmul.msk.bf16.gmra.mxu3 %vm277_vm1, %v1824_v57  ;;  %v1867_v54 = vld [vmem:[%s3497_s0 + $0x70] sm:$0xf]  ;;  %v2419_v23 = vld [vmem:[%s3499_s3 + $0x54] sm:$0xf]  ;;  %v739_v26 = vld [vmem:[%s3499_s3 + $0x148] sm:$0xff]  ;;  %v2068_v27 = vor.u32 %v2424_v22, %v2067_v21  ;;  %vm998_vm4 = vcmask 588800  }
  0x1e   :  { %v1868_v56 = vor.u32 %v2376_v55, %v1867_v54  ;;  %1053 = vmatpush.bf16.msrb.mxu1 %v2108_v11  ;;  %v1883_v29 = vld [vmem:[%s3497_s0 + $0x90] sm:$0xf]  ;;  %v2380_v30 = vld [vmem:[%s3497_s0 + $0x94] sm:$0xf0]  ;;  %v900_v33 = vunpack.c.l.b16 %v739_v26  ;;  %v2027_v36 = vld [vmem:[%s3499_s3] sm:$0xf] }
  0x1f   :  { %v2414_v37 = vld [vmem:[%s3499_s3 + $0x24] sm:$0xf0]  ;;  %v2409_v38 = vld [vmem:[%s3499_s3 + $0x4] sm:$0xf]  ;;  %v1884_v41 = vor.u32 %v2380_v30, %v1883_v29  ;;  %v2864_v45 = vld [vmem:[%s3498_s2] ss:$0 sm:$0xff] }
  0x20   :  { %328 = vmatpush.bf16.msra.mxu0 %v1908_v60  ;;  %v1885_v60 = vld [vmem:[%s3497_s0 + $0x98] sm:$0xf0]  ;;  %v950_v35 = vpack.c.b16 %v900_v33, %v900_v33  ;;  %v2028_v42 = vor.u32 %v2414_v37, %v2027_v36  ;;  %v2445_v54 = vld [vmem:[%s3499_s3 + $0x11c] sm:$0xf0]  ;;  %v2117_v10 = vld [vmem:[%s3499_s3 + $0xd0] sm:$0xf0] }
  0x21   :  { %466 = vmatpush.bf16.msra.mxu2 %v1912_v63  ;;  %v1888_v62 = vor.u32 %v2379_v59, %v1885_v60  ;;  %v2382_v22 = vld [vmem:[%s3497_s0 + $0xa4] sm:$0xf0]  ;;  %v2410_v29 = vld [vmem:[%s3499_s3 + $0xc] sm:$0xf]  ;;  %vm1477_vm5 = vcmask 392192   ;;  %vm1727_vm6 = vcmask 982016  }
  0x22   :  { %1054 = vmatpush.bf16.msrb.mxu1 %v2068_v27  ;;  %v1025_v48 = vsel %vm1017_vm2, %v950_v35, 0  ;;  %v2035_v27 = vld [vmem:[%s3499_s3 + $0x8] sm:$0xf]  ;;  %vm1784_vm7 = vcmask 490496  }
  0x23   :  { %329 = vmatmul.bf16.vlgmr.msra.gmra.mxu0 %v1812_v0 }
  0x24   :  { %467 = vmatmul.bf16.vlgmr.msra.gmra.mxu2 %v1812_v0  ;;  %v1875_v0 = vld [vmem:[%s3497_s0 + $0x80] sm:$0xf]  ;;  %1121 = vmatpush.bf16.msrb.mxu0 %v1025_v48 }
  0x25   :  { %v1876_v2 = vor.u32 %v2378_v1, %v1875_v0  ;;  %v2115_v1 = vld [vmem:[%s3499_s3 + $0xa8] sm:$0xf] }
  0x26   :  { %1055 = vmatpush.bf16.msrb.mxu1 %v2028_v42 }
  0x2c   :  { %1979 = vmatmul.msk.bf16.gmra.mxu1 %vm277_vm1, %v1832_v3 }
  0x2d   :  { %1991 = vmatmul.msk.bf16.gmra.mxu3 %vm277_vm1, %v1832_v3 }
  0x33   :  { %334 = vmatmul.bf16.gmra.mxu0 %v1820_v6 }
  0x34   :  { %472 = vmatmul.bf16.gmra.mxu2 %v1820_v6  ;;  %v2109_v6 = vld [vmem:[%s3499_s3 + $0xc8] sm:$0xf0] }
  0x3c   :  { %1980 = vmatmul.msk.bf16.gmra.mxu1 %vm277_vm1, %v1840_v9 }
  0x3d   :  { %1992 = vmatmul.msk.bf16.gmra.mxu3 %vm277_vm1, %v1840_v9  ;;  %v2112_v9 = vor.u32 %v2429_v5, %v2109_v6 }
  0x3f   :  { %1088 = vmatpush.bf16.msrb.mxu3 %v2112_v9 }
  0x43   :  { %339 = vmatmul.bf16.gmra.mxu0 %v1828_v12 }
  0x44   :  { %477 = vmatmul.bf16.gmra.mxu2 %v1828_v12  ;;  %v2381_v12 = vld [vmem:[%s3497_s0 + $0xa4] sm:$0xf] }
  0x45   :  { %v1896_v19 = vor.u32 %v2381_v12, %v1893_v13 }
  0x4c   :  { %1981 = vmatmul.msk.bf16.gmra.mxu1 %vm277_vm1, %v1848_v20 }
  0x4d   :  { %1993 = vmatmul.msk.bf16.gmra.mxu3 %vm277_vm1, %v1848_v20 }
  0x53   :  { %344 = vmatmul.bf16.gmra.mxu0 %v1836_v25 }
  0x54   :  { %482 = vmatmul.bf16.gmra.mxu2 %v1836_v25 }
  0x5c   :  { %1982 = vmatmul.msk.bf16.gmra.mxu1 %vm277_vm1, %v1856_v28 }
  0x5d   :  { %1994 = vmatmul.msk.bf16.gmra.mxu3 %vm277_vm1, %v1856_v28  ;;  %v2069_v28 = vld [vmem:[%s3499_s3 + $0x78] sm:$0xf0] }
  0x5e   :  { %v2072_v32 = vor.u32 %v2419_v23, %v2069_v28  ;;  %v2415_v28 = vld [vmem:[%s3499_s3 + $0x2c] sm:$0xf0] }
  0x5f   :  { %v2036_v33 = vor.u32 %v2415_v28, %v2035_v27 }
  0x60   :  { %1089 = vmatpush.bf16.msrb.mxu3 %v2072_v32 }
  0x63   :  { %349 = vmatmul.bf16.gmra.mxu0 %v1844_v31 }
  0x64   :  { %487 = vmatmul.bf16.gmra.mxu2 %v1844_v31  ;;  %v901_v31 = vunpack.c.h.b16 %v739_v26 }
  0x66   :  { %v951_v34 = vpack.c.b16 %v901_v31, %v901_v31 }
  0x68   :  { %v1028_v47 = vsel %vm1017_vm2, %v951_v34, 0  ;;  %v2037_v34 = vld [vmem:[%s3499_s3 + $0x30] sm:$0xf0] }
  0x69   :  { %1156 = vmatpush.bf16.msrb.mxu2 %v1028_v47  ;;  %v2040_v36 = vor.u32 %v2410_v29, %v2037_v34 }
  0x6c   :  { %1983 = vmatmul.msk.bf16.gmra.mxu1 %vm277_vm1, %v1864_v40 }
  0x6d   :  { %1995 = vmatmul.msk.bf16.gmra.mxu3 %vm277_vm1, %v1864_v40 }
  0x73   :  { %354 = vmatmul.bf16.gmra.mxu0 %v1852_v43 }
  0x74   :  { %492 = vmatmul.bf16.gmra.mxu2 %v1852_v43  ;;  %v2029_v43 = vld [vmem:[%s3499_s3 + $0x28] sm:$0xf0] }
  0x7c   :  { %1984 = vmatmul.msk.bf16.gmra.mxu1 %vm277_vm1, %v1872_v46 }
  0x7d   :  { %1996 = vmatmul.msk.bf16.gmra.mxu3 %vm277_vm1, %v1872_v46 }
  0x83   :  { %359 = vmatmul.bf16.gmra.mxu0 %v1860_v49 }
  0x84   :  { %497 = vmatmul.bf16.gmra.mxu2 %v1860_v49  ;;  %v2032_v49 = vor.u32 %v2409_v38, %v2029_v43 }
  0x86   :  { %1090 = vmatpush.bf16.msrb.mxu3 %v2032_v49 }
  0x89   :  { %v399_v53 = vpop.f32.mrf.mxu1 }
  0x8c   :  { %1985 = vmatmul.msk.bf16.gmra.mxu1 %vm277_vm1, %v1880_v52 }
  0x8d   :  { %1997 = vmatmul.msk.bf16.gmra.mxu3 %vm277_vm1, %v1880_v52 }
  0x90   :  { %v537_v57 = vpop.f32.mrf.mxu3 }
  0x91   :  { %v401_v58 = vpop.f32.mrf.mxu1 }
  0x93   :  { %364 = vmatmul.bf16.gmra.mxu0 %v1868_v56 }
  0x94   :  { %502 = vmatmul.bf16.gmra.mxu2 %v1868_v56 }
  0x98   :  { %v539_v61 = vpop.f32.mrf.mxu3 }
  0x99   :  { %v2790_v63 = vpop.f32.mrf.mxu1 }
  0x9c   :  { %1986 = vmatmul.msk.bf16.gmra.mxu1 %vm277_vm1, %v1888_v62 }
  0x9d   :  { %1998 = vmatmul.msk.bf16.gmra.mxu3 %vm277_vm1, %v1888_v62  ;;  %v1901_v62 = vld [vmem:[%s3497_s0 + $0xb8] sm:$0xf0] }
  0xa0   :  { %v330_v3 = vpop.f32.mrf.mxu0  ;;  %v2800_v4 = vpop.f32.mrf.mxu3 }
  0xa1   :  { %v2811_v8 = vpop.f32.mrf.mxu1  ;;  %v400_v17 = vadd.f32 %v399_v53, %v330_v3  ;;  %v2155_v53 = vld [vmem:[%s3499_s3 + $0xf8] sm:$0xf]  ;;  %v2430_v3 = vld [vmem:[%s3499_s3 + $0xac] sm:$0xf] }
  0xa2   :  { %v2156_v56 = vor.u32 %v2445_v54, %v2155_v53  ;;  %v2120_v13 = vor.u32 %v2430_v3, %v2117_v10  ;;  %v2384_v53 = vld [vmem:[%s3497_s0 + $0xb4] sm:$0xf0] }
  0xa3   :  { %369 = vmatmul.bf16.gmra.mxu0 %v1876_v2 }
  0xa4   :  { %507 = vmatmul.bf16.gmra.mxu2 %v1876_v2  ;;  %1122 = vmatpush.bf16.msrb.mxu0 %v2156_v56  ;;  %v2435_v2 = vld [vmem:[%s3499_s3 + $0xcc] sm:$0xf0] }
  0xa5   :  { %v2116_v9 = vor.u32 %v2435_v2, %v2115_v1 }
  0xa7   :  { %v468_v14 = vpop.f32.mrf.mxu2 }
  0xa8   :  { %v538_v15 = vadd.f32 %v537_v57, %v468_v14  ;;  %v332_v16 = vpop.f32.mrf.mxu0  ;;  %v2822_v18 = vpop.f32.mrf.mxu3  ;;  %v2440_v57 = vld [vmem:[%s3499_s3 + $0xfc] sm:$0xf]  ;;  %1123 = vmatpush.bf16.msrb.mxu0 %v2116_v9 }
  0xa9   :  { %v2824_v20 = vpop.f32.mrf.mxu1  ;;  %v402_v25 = vadd.f32 %v401_v58, %v332_v16  ;;  %v2157_v58 = vld [vmem:[%s3499_s3 + $0x120] sm:$0xf0]  ;;  %v2425_v16 = vld [vmem:[%s3499_s3 + $0x7c] sm:$0xf0] }
  0xaa   :  { %v598_v24 = vmax.f32 %v400_v17, %v538_v15  ;;  %v2160_v59 = vor.u32 %v2440_v57, %v2157_v58  ;;  %v2420_v17 = vld [vmem:[%s3499_s3 + $0x5c] sm:$0xf] }
  0xac   :  { %1987 = vmatmul.msk.bf16.gmra.mxu1 %vm277_vm1, %v1896_v19  ;;  %v599_v39 = vmax.f32 %v598_v24, %v402_v25  ;;  %1157 = vmatpush.bf16.msrb.mxu2 %v2160_v59  ;;  %v2077_v24 = vld [vmem:[%s3499_s3 + $0x80] sm:$0xf0] }
  0xad   :  { %1999 = vmatmul.msk.bf16.gmra.mxu3 %vm277_vm1, %v1896_v19  ;;  %v2080_v25 = vor.u32 %v2420_v17, %v2077_v24 }
  0xaf   :  { %v470_v40 = vpop.f32.mrf.mxu2 }
  0xb0   :  { %v540_v44 = vadd.f32 %v539_v61, %v470_v40  ;;  %v335_v46 = vpop.f32.mrf.mxu0  ;;  %v2868_v50 = vpop.f32.mrf.mxu3  ;;  %v2383_v61 = vld [vmem:[%s3497_s0 + $0xb4] sm:$0xf]  ;;  %1158 = vmatpush.bf16.msrb.mxu2 %v2120_v13 }
  0xb1   :  { %v2870_v52 = vpop.f32.mrf.mxu1  ;;  %v1904_v12 = vor.u32 %v2383_v61, %v1901_v62  ;;  %v405_v14 = vadd.f32 %v2790_v63, %v335_v46  ;;  %v1891_v63 = vld [vmem:[%s3497_s0 + $0xa0] sm:$0xf] }
  0xb2   :  { %v600_v51 = vmax.f32 %v599_v39, %v540_v44  ;;  %v1892_v26 = vor.u32 %v2382_v22, %v1891_v63 }
  0xb3   :  { %374 = vmatmul.bf16.gmra.mxu0 %v1884_v41 }
  0xb4   :  { %v604_v55 = vadd.f32 %v2864_v45, %v600_v51  ;;  %512 = vmatmul.bf16.gmra.mxu2 %v1884_v41  ;;  %v1899_v51 = vld [vmem:[%s3497_s0 + $0xb0] sm:$0xf] }
  0xb5   :  { %1159 = vmatpush.bf16.msrb.mxu2 %v2080_v25 }
  0xb6   :  { %v605_v60 = vmax.f32 %v604_v55, 0.0 }
  0xb7   :  { %v473_v0 = vpop.f32.mrf.mxu2 }
  0xb8   :  { %v606_v5 = vpack.c.bf16 %v605_v60, %v605_v60  ;;  %v543_v6 = vadd.f32 %v2800_v4, %v473_v0  ;;  %v337_v7 = vpop.f32.mrf.mxu0  ;;  %v549_v11 = vpop.f32.mrf.mxu3  ;;  %v2075_v4 = vld [vmem:[%s3499_s3 + $0x58] sm:$0xf] }
  0xb9   :  { %v2906_v15 = vpop.f32.mrf.mxu1  ;;  %v407_v21 = vadd.f32 %v2811_v8, %v337_v7  ;;  %v2076_v23 = vor.u32 %v2425_v16, %v2075_v4  ;;  %1160 = vmatpush.bf16.msrb.mxu2 %v2040_v36 }
  0xba   :  { %608 = vst.msk [vmem:[#allocation2] sm:$0xf] %vm607_vm3, %v606_v5  ;;  %v609_v19 = vmax.f32 %v405_v14, %v543_v6 }
  0xbb   :  { %1124 = vmatpush.bf16.msrb.mxu0 %v2076_v23 }
  0xbc   :  { %1988 = vmatmul.msk.bf16.gmra.mxu1 %vm277_vm1, %v1904_v12  ;;  %v610_v30 = vmax.f32 %v609_v19, %v407_v21 }
  0xbd   :  { %2000 = vmatmul.msk.bf16.gmra.mxu3 %vm277_vm1, %v1904_v12 }
  0xbf   :  { %v475_v8 = vpop.f32.mrf.mxu2  ;;  %1125 = vmatpush.bf16.msrb.mxu0 %v2036_v33 }
  0xc0   :  { %v545_v31 = vadd.f32 %v2822_v18, %v475_v8  ;;  %v340_v32 = vpop.f32.mrf.mxu0  ;;  %v552_v35 = vpop.f32.mrf.mxu3 }
  0xc1   :  { %v416_v38 = vpop.f32.mrf.mxu1  ;;  %v410_v46 = vadd.f32 %v2824_v20, %v340_v32  ;;  %v2003_v58 = vld [vmem:[#allocation2] sm:$0xf] }
  0xc2   :  { %v611_v37 = vmax.f32 %v610_v30, %v545_v31 }
  0xc3   :  { %379 = vmatmul.bf16.gmra.mxu0 %v1892_v26 }
  0xc4   :  { %v612_v39 = vadd.f32 %v2864_v45, %v611_v37  ;;  %517 = vmatmul.bf16.gmra.mxu2 %v1892_v26 }
  0xc6   :  { %v613_v40 = vmax.f32 %v612_v39, 0.0 }
  0xc7   :  { %v478_v41 = vpop.f32.mrf.mxu2 }
  0xc8   :  { %v614_v42 = vpack.c.bf16 %v613_v40, %v613_v40  ;;  %v548_v18 = vadd.f32 %v2868_v50, %v478_v41  ;;  %v342_v43 = vpop.f32.mrf.mxu0  ;;  %v554_v44 = vpop.f32.mrf.mxu3  ;;  %v1900_v50 = vor.u32 %v2384_v53, %v1899_v51 }
  0xc9   :  { %v419_v47 = vpop.f32.mrf.mxu1  ;;  %v412_v49 = vadd.f32 %v2870_v52, %v342_v43 }
  0xca   :  { %615 = vst.msk [vmem:[#allocation2 + $0x4] sm:$0xf] %vm607_vm3, %v614_v42  ;;  %v616_v48 = vmax.f32 %v410_v46, %v548_v18 }
  0xcc   :  { %v617_v55 = vmax.f32 %v616_v48, %v412_v49 }
  0xcf   :  { %v480_v54 = vpop.f32.mrf.mxu2 }
  0xd0   :  { %v550_v56 = vadd.f32 %v549_v11, %v480_v54  ;;  %v345_v57 = vpop.f32.mrf.mxu0  ;;  %v557_v20 = vpop.f32.mrf.mxu3 }
  0xd1   :  { %v2403_v59 = vld [vmem:[#allocation2] sm:$0xf0]  ;;  %v421_v61 = vpop.f32.mrf.mxu1  ;;  %v415_v7 = vadd.f32 %v2906_v15, %v345_v57 }
  0xd2   :  { %v2953_v60 = vor.u32 %v2403_v59, %v2003_v58  ;;  %v618_v52 = vmax.f32 %v617_v55, %v550_v56 }
  0xd3   :  { %384 = vmatmul.bf16.gmra.mxu0 %v1900_v50 }
  0xd4   :  { %v619_v62 = vadd.f32 %v2864_v45, %v618_v52  ;;  %522 = vmatmul.bf16.gmra.mxu2 %v1900_v50  ;;  %2185 = vmatmul.msk.bf16.vlgmr.msrb.gmra.mxu1 %vm998_vm4, %v2953_v60 }
  0xd5   :  { %2191 = vmatmul.msk.bf16.vlgmr.msrb.gmra.mxu3 %vm998_vm4, %v2953_v60 }
  0xd6   :  { %v620_v0 = vmax.f32 %v619_v62, 0.0 }
  0xd7   :  { %v483_v1 = vpop.f32.mrf.mxu2 }
  0xd8   :  { %v621_v2 = vpack.c.bf16 %v620_v0, %v620_v0  ;;  %v553_v3 = vadd.f32 %v552_v35, %v483_v1  ;;  %v347_v5 = vpop.f32.mrf.mxu0  ;;  %v559_v6 = vpop.f32.mrf.mxu3 }
  0xd9   :  { %v424_v9 = vpop.f32.mrf.mxu1  ;;  %v417_v11 = vadd.f32 %v416_v38, %v347_v5 }
  0xda   :  { %622 = vst.msk [vmem:[#allocation2 + $0x8] sm:$0xf] %vm607_vm3, %v621_v2  ;;  %v623_v10 = vmax.f32 %v415_v7, %v553_v3 }
  0xdc   :  { %v624_v13 = vmax.f32 %v623_v10, %v417_v11 }
  0xdf   :  { %v485_v12 = vpop.f32.mrf.mxu2 }
  0xe0   :  { %v555_v14 = vadd.f32 %v554_v44, %v485_v12  ;;  %v350_v4 = vpop.f32.mrf.mxu0  ;;  %v562_v16 = vpop.f32.mrf.mxu3 }
  0xe1   :  { %v426_v19 = vpop.f32.mrf.mxu1  ;;  %v420_v8 = vadd.f32 %v419_v47, %v350_v4  ;;  %v2007_v33 = vld [vmem:[#allocation2 + $0x8] sm:$0xf] }
  0xe2   :  { %v625_v17 = vmax.f32 %v624_v13, %v555_v14  ;;  %v740_v14 = vld [vmem:[%s3499_s3 + $0x150] sm:$0xff] }
  0xe3   :  { %2197 = vmatmul.msk.bf16.vlgmr.msrb.gmra.mxu0 %vm998_vm4, %v2953_v60  ;;  %v903_v4 = vunpack.c.h.b16 %v740_v14 }
  0xe4   :  { %v626_v21 = vadd.f32 %v2864_v45, %v625_v17  ;;  %2203 = vmatmul.msk.bf16.vlgmr.msrb.gmra.mxu2 %vm998_vm4, %v2953_v60 }
  0xe6   :  { %v627_v63 = vmax.f32 %v626_v21, 0.0  ;;  %v953_v21 = vpack.c.b16 %v903_v4, %v903_v4 }
  0xe7   :  { %v488_v15 = vpop.f32.mrf.mxu2 }
  0xe8   :  { %v628_v22 = vpack.c.bf16 %v627_v63, %v627_v63  ;;  %v558_v23 = vadd.f32 %v557_v20, %v488_v15  ;;  %v352_v24 = vpop.f32.mrf.mxu0  ;;  %v564_v25 = vpop.f32.mrf.mxu3 }
  0xe9   :  { %v422_v27 = vadd.f32 %v421_v61, %v352_v24  ;;  %v429_v28 = vpop.f32.mrf.mxu1 }
  0xea   :  { %629 = vst.msk [vmem:[#allocation2 + $0xc] sm:$0xf] %vm607_vm3, %v628_v22  ;;  %v630_v26 = vmax.f32 %v420_v8, %v558_v23  ;;  %v1034_v23 = vsel %vm1017_vm2, %v953_v21, 0 }
  0xeb   :  { %1226 = vmatpush.bf16.msra.mxu3 %v1034_v23 }
  0xec   :  { %v631_v30 = vmax.f32 %v630_v26, %v422_v27 }
  0xef   :  { %v490_v29 = vpop.f32.mrf.mxu2 }
  0xf0   :  { %v560_v31 = vadd.f32 %v559_v6, %v490_v29  ;;  %v355_v32 = vpop.f32.mrf.mxu0  ;;  %v567_v35 = vpop.f32.mrf.mxu3 }
  0xf1   :  { %v2404_v34 = vld [vmem:[#allocation2 + $0x8] sm:$0xf0]  ;;  %v431_v41 = vpop.f32.mrf.mxu1  ;;  %v425_v44 = vadd.f32 %v424_v9, %v355_v32 }
  0xf2   :  { %v2968_v36 = vor.u32 %v2404_v34, %v2007_v33  ;;  %v632_v37 = vmax.f32 %v631_v30, %v560_v31 }
  0xf4   :  { %v633_v38 = vadd.f32 %v2864_v45, %v632_v37  ;;  %2186 = vmatmul.msk.bf16.gmra.mxu1 %vm998_vm4, %v2968_v36  ;;  %2192 = vmatmul.msk.bf16.gmra.mxu3 %vm998_vm4, %v2968_v36  ;;  %v2441_v37 = vld [vmem:[%s3499_s3 + $0x104] sm:$0xf] }
  0xf5   :  { %2198 = vmatmul.msk.bf16.gmra.mxu0 %vm998_vm4, %v2968_v36  ;;  %2204 = vmatmul.msk.bf16.gmra.mxu2 %vm998_vm4, %v2968_v36 }
  0xf6   :  { %v634_v39 = vmax.f32 %v633_v38, 0.0  ;;  %v2165_v38 = vld [vmem:[%s3499_s3 + $0x128] sm:$0xf0] }
  0xf7   :  { %v493_v40 = vpop.f32.mrf.mxu2 }
  0xf8   :  { %v635_v42 = vpack.c.bf16 %v634_v39, %v634_v39  ;;  %v563_v18 = vadd.f32 %v562_v16, %v493_v40  ;;  %v357_v43 = vpop.f32.mrf.mxu0  ;;  %v569_v46 = vpop.f32.mrf.mxu3  ;;  %v902_v16 = vunpack.c.l.b16 %v740_v14  ;;  %v2168_v40 = vor.u32 %v2441_v37, %v2165_v38 }
  0xf9   :  { %v427_v48 = vadd.f32 %v426_v19, %v357_v43  ;;  %v434_v50 = vpop.f32.mrf.mxu1 }
  0xfa   :  { %636 = vst.msk [vmem:[#allocation2 + $0x10] sm:$0xf] %vm607_vm3, %v635_v42  ;;  %v637_v47 = vmax.f32 %v425_v44, %v563_v18  ;;  %v952_v63 = vpack.c.b16 %v902_v16, %v902_v16  ;;  %v2446_v42 = vld [vmem:[%s3499_s3 + $0x124] sm:$0xf0]  ;;  %1227 = vmatpush.bf16.msra.mxu3 %v2168_v40 }
  0xfc   :  { %v638_v51 = vmax.f32 %v637_v47, %v427_v48  ;;  %v1031_v24 = vsel %vm1017_vm2, %v952_v63, 0 }
  0xfd   :  { %1191 = vmatpush.bf16.msra.mxu1 %v1031_v24  ;;  %v2123_v24 = vld [vmem:[%s3499_s3 + $0xb0] sm:$0xf] }
  0xff   :  { %v495_v49 = vpop.f32.mrf.mxu2 }
 0x100   :  { %v565_v53 = vadd.f32 %v564_v25, %v495_v49  ;;  %v360_v54 = vpop.f32.mrf.mxu0  ;;  %v572_v57 = vpop.f32.mrf.mxu3 }
 0x101   :  { %v430_v62 = vadd.f32 %v429_v28, %v360_v54  ;;  %v436_v0 = vpop.f32.mrf.mxu1  ;;  %v2011_v10 = vld [vmem:[#allocation2 + $0x10] sm:$0xf] }
 0x102   :  { %v639_v55 = vmax.f32 %v638_v51, %v565_v53 }
 0x104   :  { %v640_v56 = vadd.f32 %v2864_v45, %v639_v55 }
 0x106   :  { %v641_v58 = vmax.f32 %v640_v56, 0.0 }
 0x107   :  { %v498_v59 = vpop.f32.mrf.mxu2 }
 0x108   :  { %v642_v20 = vpack.c.bf16 %v641_v58, %v641_v58  ;;  %v568_v52 = vadd.f32 %v567_v35, %v498_v59  ;;  %v362_v61 = vpop.f32.mrf.mxu0  ;;  %v574_v5 = vpop.f32.mrf.mxu3 }
 0x109   :  { %v432_v2 = vadd.f32 %v431_v41, %v362_v61  ;;  %v439_v19 = vpop.f32.mrf.mxu1  ;;  %v2163_v41 = vld [vmem:[%s3499_s3 + $0x100] sm:$0xf] }
 0x10a   :  { %643 = vst.msk [vmem:[#allocation2 + $0x14] sm:$0xf] %vm607_vm3, %v642_v20  ;;  %v644_v1 = vmax.f32 %v430_v62, %v568_v52  ;;  %v2164_v43 = vor.u32 %v2446_v42, %v2163_v41  ;;  %v741_v42 = vld [vmem:[%s3499_s3 + $0x158] sm:$0xff] }
 0x10c   :  { %v645_v6 = vmax.f32 %v644_v1, %v432_v2  ;;  %1192 = vmatpush.bf16.msra.mxu1 %v2164_v43  ;;  %v2431_v1 = vld [vmem:[%s3499_s3 + $0xb4] sm:$0xf]  ;;  %v2125_v2 = vld [vmem:[%s3499_s3 + $0xd8] sm:$0xf0]  ;;  %v905_v43 = vunpack.c.h.b16 %v741_v42 }
 0x10f   :  { %v500_v3 = vpop.f32.mrf.mxu2 }
 0x110   :  { %v570_v7 = vadd.f32 %v569_v46, %v500_v3  ;;  %v365_v9 = vpop.f32.mrf.mxu0  ;;  %v577_v27 = vpop.f32.mrf.mxu3 }
 0x111   :  { %v2405_v11 = vld [vmem:[#allocation2 + $0x10] sm:$0xf0]  ;;  %v435_v28 = vadd.f32 %v434_v50, %v365_v9  ;;  %v441_v31 = vpop.f32.mrf.mxu1 }
 0x112   :  { %v2982_v12 = vor.u32 %v2405_v11, %v2011_v10  ;;  %v646_v13 = vmax.f32 %v645_v6, %v570_v7 }
 0x114   :  { %v647_v17 = vadd.f32 %v2864_v45, %v646_v13  ;;  %2187 = vmatmul.msk.bf16.gmra.mxu1 %vm998_vm4, %v2982_v12  ;;  %2193 = vmatmul.msk.bf16.gmra.mxu3 %vm998_vm4, %v2982_v12 }
 0x115   :  { %2199 = vmatmul.msk.bf16.gmra.mxu0 %vm998_vm4, %v2982_v12  ;;  %2205 = vmatmul.msk.bf16.gmra.mxu2 %vm998_vm4, %v2982_v12 }
 0x116   :  { %v648_v15 = vmax.f32 %v647_v17, 0.0 }
 0x117   :  { %v503_v22 = vpop.f32.mrf.mxu2 }
 0x118   :  { %v649_v25 = vpack.c.bf16 %v648_v15, %v648_v15  ;;  %v573_v8 = vadd.f32 %v572_v57, %v503_v22  ;;  %v367_v26 = vpop.f32.mrf.mxu0  ;;  %v579_v18 = vpop.f32.mrf.mxu3 }
 0x119   :  { %v437_v30 = vadd.f32 %v436_v0, %v367_v26  ;;  %v444_v53 = vpop.f32.mrf.mxu1 }
 0x11a   :  { %650 = vst.msk [vmem:[#allocation2 + $0x18] sm:$0xf] %vm607_vm3, %v649_v25  ;;  %v651_v29 = vmax.f32 %v435_v28, %v573_v8  ;;  %v2436_v25 = vld [vmem:[%s3499_s3 + $0xd4] sm:$0xf0]  ;;  %v2085_v28 = vld [vmem:[%s3499_s3 + $0x88] sm:$0xf0] }
 0x11b   :  { %v2124_v26 = vor.u32 %v2436_v25, %v2123_v24  ;;  %v2133_v25 = vld [vmem:[%s3499_s3 + $0xe0] sm:$0xf0] }
 0x11c   :  { %v652_v33 = vmax.f32 %v651_v29, %v437_v30 }
 0x11d   :  { %1193 = vmatpush.bf16.msra.mxu1 %v2124_v26 }
 0x11f   :  { %v505_v32 = vpop.f32.mrf.mxu2 }
 0x120   :  { %v575_v34 = vadd.f32 %v574_v5, %v505_v32  ;;  %v370_v35 = vpop.f32.mrf.mxu0  ;;  %v582_v56 = vpop.f32.mrf.mxu3  ;;  %v2128_v5 = vor.u32 %v2431_v1, %v2125_v2  ;;  %v2171_v1 = vld [vmem:[%s3499_s3 + $0x108] sm:$0xf] }
 0x121   :  { %v440_v54 = vadd.f32 %v439_v19, %v370_v35  ;;  %v2015_v52 = vld [vmem:[#allocation2 + $0x18] sm:$0xf]  ;;  %v446_v3 = vpop.f32.mrf.mxu1 }
 0x122   :  { %v653_v39 = vmax.f32 %v652_v33, %v575_v34  ;;  %1228 = vmatpush.bf16.msra.mxu3 %v2128_v5  ;;  %v2447_v5 = vld [vmem:[%s3499_s3 + $0x12c] sm:$0xf0] }
 0x124   :  { %v654_v44 = vadd.f32 %v2864_v45, %v653_v39 }
 0x126   :  { %v655_v46 = vmax.f32 %v654_v44, 0.0 }
 0x127   :  { %v508_v47 = vpop.f32.mrf.mxu2 }
 0x128   :  { %v656_v48 = vpack.c.bf16 %v655_v46, %v655_v46  ;;  %v578_v49 = vadd.f32 %v577_v27, %v508_v47  ;;  %v372_v51 = vpop.f32.mrf.mxu0  ;;  %v584_v9 = vpop.f32.mrf.mxu3  ;;  %v2421_v27 = vld [vmem:[%s3499_s3 + $0x64] sm:$0xf]  ;;  %v955_v47 = vpack.c.b16 %v905_v43, %v905_v43 }
 0x129   :  { %v442_v55 = vadd.f32 %v441_v31, %v372_v51  ;;  %v449_v19 = vpop.f32.mrf.mxu1  ;;  %v2088_v29 = vor.u32 %v2421_v27, %v2085_v28  ;;  %v2091_v28 = vld [vmem:[%s3499_s3 + $0x68] sm:$0xf] }
 0x12a   :  { %657 = vst.msk [vmem:[#allocation2 + $0x1c] sm:$0xf] %vm607_vm3, %v656_v48  ;;  %v658_v50 = vmax.f32 %v440_v54, %v578_v49 }
 0x12b   :  { %1229 = vmatpush.bf16.msra.mxu3 %v2088_v29  ;;  %v2427_v29 = vld [vmem:[%s3499_s3 + $0x8c] sm:$0xf0] }
 0x12c   :  { %v659_v58 = vmax.f32 %v658_v50, %v442_v55 }
 0x12f   :  { %v510_v57 = vpop.f32.mrf.mxu2 }
 0x130   :  { %v580_v59 = vadd.f32 %v579_v18, %v510_v57  ;;  %v375_v20 = vpop.f32.mrf.mxu0  ;;  %v587_v23 = vpop.f32.mrf.mxu3  ;;  %v904_v18 = vunpack.c.l.b16 %v741_v42 }
 0x131   :  { %v2406_v61 = vld [vmem:[#allocation2 + $0x18] sm:$0xf0]  ;;  %v445_v4 = vadd.f32 %v444_v53, %v375_v20  ;;  %v451_v32 = vpop.f32.mrf.mxu1  ;;  %v2426_v20 = vld [vmem:[%s3499_s3 + $0x84] sm:$0xf0] }
 0x132   :  { %v3013_v62 = vor.u32 %v2406_v61, %v2015_v52  ;;  %v660_v0 = vmax.f32 %v659_v58, %v580_v59  ;;  %v954_v46 = vpack.c.b16 %v904_v18, %v904_v18  ;;  %v2083_v59 = vld [vmem:[%s3499_s3 + $0x60] sm:$0xf]  ;;  %v2411_v61 = vld [vmem:[%s3499_s3 + $0x14] sm:$0xf] }
 0x133   :  { %v2084_v52 = vor.u32 %v2426_v20, %v2083_v59 }
 0x134   :  { %v661_v6 = vadd.f32 %v2864_v45, %v660_v0  ;;  %2188 = vmatmul.msk.bf16.gmra.mxu1 %vm998_vm4, %v3013_v62  ;;  %2194 = vmatmul.msk.bf16.gmra.mxu3 %vm998_vm4, %v3013_v62  ;;  %v1037_v55 = vsel %vm1017_vm2, %v954_v46, 0  ;;  %v2045_v0 = vld [vmem:[%s3499_s3 + $0x38] sm:$0xf0]  ;;  %v2053_v46 = vld [vmem:[%s3499_s3 + $0x40] sm:$0xf0] }
 0x135   :  { %2200 = vmatmul.msk.bf16.gmra.mxu0 %vm998_vm4, %v3013_v62  ;;  %2206 = vmatmul.msk.bf16.gmra.mxu2 %vm998_vm4, %v3013_v62 }
 0x136   :  { %v662_v7 = vmax.f32 %v661_v6, 0.0  ;;  %1261 = vmatpush.bf16.msra.mxu0 %v1037_v55  ;;  %v2442_v6 = vld [vmem:[%s3499_s3 + $0x10c] sm:$0xf]  ;;  %1194 = vmatpush.bf16.msra.mxu1 %v2084_v52 }
 0x137   :  { %v513_v10 = vpop.f32.mrf.mxu2 }
 0x138   :  { %v663_v11 = vpack.c.bf16 %v662_v7, %v662_v7  ;;  %v583_v13 = vadd.f32 %v582_v56, %v513_v10  ;;  %v377_v14 = vpop.f32.mrf.mxu0  ;;  %v589_v39 = vpop.f32.mrf.mxu3  ;;  %v1040_v56 = vsel %vm1017_vm2, %v955_v47, 0  ;;  %v2173_v7 = vld [vmem:[%s3499_s3 + $0x130] sm:$0xf0]  ;;  %v2043_v10 = vld [vmem:[%s3499_s3 + $0x10] sm:$0xf] }
 0x139   :  { %v447_v17 = vadd.f32 %v446_v3, %v377_v14  ;;  %v454_v50 = vpop.f32.mrf.mxu1  ;;  %1296 = vmatpush.bf16.msra.mxu2 %v1040_v56  ;;  %v2048_v3 = vor.u32 %v2411_v61, %v2045_v0  ;;  %v2176_v14 = vor.u32 %v2442_v6, %v2173_v7  ;;  %v2448_v6 = vld [vmem:[%s3499_s3 + $0x134] sm:$0xf0] }
 0x13a   :  { %664 = vst.msk [vmem:[#allocation2 + $0x20] sm:$0xf] %vm607_vm3, %v663_v11  ;;  %v665_v16 = vmax.f32 %v445_v4, %v583_v13  ;;  %v2416_v11 = vld [vmem:[%s3499_s3 + $0x34] sm:$0xf0]  ;;  %v2172_v13 = vor.u32 %v2447_v5, %v2171_v1  ;;  %v2443_v1 = vld [vmem:[%s3499_s3 + $0x114] sm:$0xf] }
 0x13b   :  { %1230 = vmatpush.bf16.msra.mxu3 %v2048_v3  ;;  %v2179_v5 = vld [vmem:[%s3499_s3 + $0x110] sm:$0xf] }
 0x13c   :  { %v666_v63 = vmax.f32 %v665_v16, %v447_v17  ;;  %v2044_v16 = vor.u32 %v2416_v11, %v2043_v10  ;;  %1262 = vmatpush.bf16.msra.mxu0 %v2172_v13  ;;  %v2180_v7 = vor.u32 %v2448_v6, %v2179_v5  ;;  %v2433_v11 = vld [vmem:[%s3499_s3 + $0xc4] sm:$0xf]  ;;  %v2141_v13 = vld [vmem:[%s3499_s3 + $0xe8] sm:$0xf0] }
 0x13d   :  { %1297 = vmatpush.bf16.msra.mxu2 %v2176_v14  ;;  %v2139_v14 = vld [vmem:[%s3499_s3 + $0xc0] sm:$0xf] }
 0x13e   :  { %1195 = vmatpush.bf16.msra.mxu1 %v2044_v16  ;;  %v2438_v16 = vld [vmem:[%s3499_s3 + $0xe4] sm:$0xf0] }
 0x13f   :  { %v515_v21 = vpop.f32.mrf.mxu2 }
 0x140   :  { %v585_v15 = vadd.f32 %v584_v9, %v515_v21  ;;  %v380_v22 = vpop.f32.mrf.mxu0  ;;  %v592_v9 = vpop.f32.mrf.mxu3  ;;  %v2437_v21 = vld [vmem:[%s3499_s3 + $0xdc] sm:$0xf0] }
 0x141   :  { %v450_v38 = vadd.f32 %v449_v19, %v380_v22  ;;  %v2019_v53 = vld [vmem:[#allocation2 + $0x20] sm:$0xf]  ;;  %v2131_v19 = vld [vmem:[%s3499_s3 + $0xb8] sm:$0xf]  ;;  %v456_v27 = vpop.f32.mrf.mxu1 }
 0x142   :  { %v667_v8 = vmax.f32 %v666_v63, %v585_v15  ;;  %v2432_v63 = vld [vmem:[%s3499_s3 + $0xbc] sm:$0xf]  ;;  %v2132_v24 = vor.u32 %v2437_v21, %v2131_v19 }
 0x144   :  { %v668_v30 = vadd.f32 %v2864_v45, %v667_v8  ;;  %v2136_v8 = vor.u32 %v2432_v63, %v2133_v25  ;;  %1263 = vmatpush.bf16.msra.mxu0 %v2132_v24 }
 0x146   :  { %v669_v31 = vmax.f32 %v668_v30, 0.0  ;;  %1298 = vmatpush.bf16.msra.mxu2 %v2136_v8  ;;  %v2422_v30 = vld [vmem:[%s3499_s3 + $0x6c] sm:$0xf]  ;;  %v2423_v8 = vld [vmem:[%s3499_s3 + $0x74] sm:$0xf] }
 0x147   :  { %v518_v33 = vpop.f32.mrf.mxu2 }
 0x148   :  { %v670_v34 = vpack.c.bf16 %v669_v31, %v669_v31  ;;  %v588_v35 = vadd.f32 %v587_v23, %v518_v33  ;;  %v382_v37 = vpop.f32.mrf.mxu0  ;;  %v2092_v33 = vor.u32 %v2427_v29, %v2091_v28 }
 0x149   :  { %v452_v41 = vadd.f32 %v451_v32, %v382_v37  ;;  %v594_v37 = vpop.f32.mrf.mxu3 }
 0x14a   :  { %671 = vst.msk [vmem:[#allocation2 + $0x24] sm:$0xf] %vm607_vm3, %v670_v34  ;;  %v672_v40 = vmax.f32 %v450_v38, %v588_v35  ;;  %v2093_v34 = vld [vmem:[%s3499_s3 + $0x90] sm:$0xf0]  ;;  %1264 = vmatpush.bf16.msra.mxu0 %v2092_v33  ;;  %v2428_v33 = vld [vmem:[%s3499_s3 + $0x94] sm:$0xf0] }
 0x14b   :  { %v2096_v35 = vor.u32 %v2422_v30, %v2093_v34 }
 0x14c   :  { %v673_v48 = vmax.f32 %v672_v40, %v452_v41  ;;  %v2417_v40 = vld [vmem:[%s3499_s3 + $0x3c] sm:$0xf0]  ;;  %v2412_v41 = vld [vmem:[%s3499_s3 + $0x1c] sm:$0xf] }
 0x14d   :  { %1299 = vmatpush.bf16.msra.mxu2 %v2096_v35  ;;  %v2056_v47 = vor.u32 %v2412_v41, %v2053_v46 }
 0x14f   :  { %v520_v44 = vpop.f32.mrf.mxu2 }
 0x150   :  { %v590_v49 = vadd.f32 %v589_v39, %v520_v44  ;;  %v385_v51 = vpop.f32.mrf.mxu0  ;;  %v2051_v39 = vld [vmem:[%s3499_s3 + $0x18] sm:$0xf] }
 0x151   :  { %v2407_v54 = vld [vmem:[#allocation2 + $0x20] sm:$0xf0]  ;;  %v455_v26 = vadd.f32 %v454_v50, %v385_v51  ;;  %v2052_v44 = vor.u32 %v2417_v40, %v2051_v39  ;;  %1300 = vmatpush.bf16.msra.mxu2 %v2056_v47  ;;  %v2059_v47 = vld [vmem:[%s3499_s3 + $0x20] sm:$0xf] }
 0x152   :  { %v3050_v57 = vor.u32 %v2407_v54, %v2019_v53  ;;  %v674_v58 = vmax.f32 %v673_v48, %v590_v49  ;;  %v742_v51 = vld [vmem:[%s3499_s3 + $0x160] sm:$0xff] }
 0x153   :  { %1265 = vmatpush.bf16.msra.mxu0 %v2052_v44  ;;  %v907_v54 = vunpack.c.h.b16 %v742_v51  ;;  %v906_v50 = vunpack.c.l.b16 %v742_v51  ;;  %v2061_v44 = vld [vmem:[%s3499_s3 + $0x48] sm:$0xf0] }
 0x154   :  { %v675_v2 = vadd.f32 %v2864_v45, %v674_v58  ;;  %2189 = vmatmul.msk.bf16.gmra.mxu1 %vm998_vm4, %v3050_v57  ;;  %2195 = vmatmul.msk.bf16.gmra.mxu3 %vm998_vm4, %v3050_v57 }
 0x155   :  { %2201 = vmatmul.msk.bf16.gmra.mxu0 %vm998_vm4, %v3050_v57  ;;  %2207 = vmatmul.msk.bf16.gmra.mxu2 %vm998_vm4, %v3050_v57  ;;  %v957_v58 = vpack.c.b16 %v907_v54, %v907_v54  ;;  %v956_v59 = vpack.c.b16 %v906_v50, %v906_v50 }
 0x156   :  { %v676_v4 = vmax.f32 %v675_v2, 0.0  ;;  %v2181_v2 = vld [vmem:[%s3499_s3 + $0x138] sm:$0xf0] }
 0x157   :  { %v523_v17 = vpop.f32.mrf.mxu2  ;;  %v1046_v20 = vsel %vm1017_vm2, %v957_v58, 0  ;;  %v1043_v52 = vsel %vm1017_vm2, %v956_v59, 0  ;;  %v2184_v3 = vor.u32 %v2443_v1, %v2181_v2 }
 0x158   :  { %v677_v15 = vpack.c.bf16 %v676_v4, %v676_v4  ;;  %v593_v22 = vadd.f32 %v592_v9, %v523_v17  ;;  %v387_v23 = vpop.f32.mrf.mxu0  ;;  %1366 = vmatpush.bf16.msrb.mxu3 %v1046_v20  ;;  %1331 = vmatpush.bf16.msrb.mxu1 %v1043_v52  ;;  %v3157_v9 = vpop.f32.mrf.mxu1  ;;  %v2144_v4 = vor.u32 %v2433_v11, %v2141_v13 }
 0x159   :  { %v457_v32 = vadd.f32 %v456_v27, %v387_v23  ;;  %v2140_v17 = vor.u32 %v2438_v16, %v2139_v14  ;;  %v3181_v19 = vpop.f32.mrf.mxu3 }
 0x15a   :  { %678 = vst.msk [vmem:[#allocation2 + $0x28] sm:$0xf] %vm607_vm3, %v677_v15  ;;  %v679_v31 = vmax.f32 %v455_v26, %v593_v22  ;;  %v2101_v26 = vld [vmem:[%s3499_s3 + $0x98] sm:$0xf0] }
 0x15b   :  { %v2104_v28 = vor.u32 %v2423_v8, %v2101_v26 }
 0x15c   :  { %v680_v42 = vmax.f32 %v679_v31, %v457_v32  ;;  %1367 = vmatpush.bf16.msrb.mxu3 %v2184_v3  ;;  %1332 = vmatpush.bf16.msrb.mxu1 %v2180_v7  ;;  %v2099_v32 = vld [vmem:[%s3499_s3 + $0x70] sm:$0xf] }
 0x15d   :  { %v2100_v34 = vor.u32 %v2428_v33, %v2099_v32 }
 0x15f   :  { %v525_v38 = vpop.f32.mrf.mxu2 }
 0x160   :  { %v595_v18 = vadd.f32 %v594_v37, %v525_v38  ;;  %v1127_v43 = vpop.f32.mrf.mxu0  ;;  %1368 = vmatpush.bf16.msrb.mxu3 %v2144_v4  ;;  %1333 = vmatpush.bf16.msrb.mxu1 %v2140_v17  ;;  %v3185_v63 = vpop.f32.mrf.mxu1 }
 0x161   :  { %v3189_v22 = vpop.f32.mrf.mxu3  ;;  %v2413_v43 = vld [vmem:[%s3499_s3 + $0x24] sm:$0xf] }
 0x162   :  { %v681_v48 = vmax.f32 %v680_v42, %v595_v18  ;;  %v2064_v46 = vor.u32 %v2413_v43, %v2061_v44 }
 0x164   :  { %v682_v49 = vadd.f32 %v2864_v45, %v681_v48  ;;  %v2023_v45 = vld [vmem:[#allocation2 + $0x28] sm:$0xf]  ;;  %1369 = vmatpush.bf16.msrb.mxu3 %v2104_v28  ;;  %1334 = vmatpush.bf16.msrb.mxu1 %v2100_v34 }
 0x165   :  { %v2418_v48 = vld [vmem:[%s3499_s3 + $0x44] sm:$0xf0] }
 0x166   :  { %v683_v53 = vmax.f32 %v682_v49, 0.0  ;;  %v2060_v49 = vor.u32 %v2418_v48, %v2059_v47 }
 0x167   :  { %v1162_v55 = vpop.f32.mrf.mxu2 }
 0x168   :  { %v684_v56 = vpack.c.bf16 %v683_v53, %v683_v53  ;;  %v3159_v10 = vpop.f32.mrf.mxu0  ;;  %1370 = vmatpush.bf16.msrb.mxu3 %v2064_v46  ;;  %1335 = vmatpush.bf16.msrb.mxu1 %v2060_v49 }
 0x16a   :  { %685 = vst.msk [vmem:[#allocation2 + $0x2c] sm:$0xf] %vm607_vm3, %v684_v56 }
 0x16f   :  { %v3183_v21 = vpop.f32.mrf.mxu2 }
 0x171   :  { %v2408_v61 = vld [vmem:[#allocation2 + $0x28] sm:$0xf0]  ;;  %v3201_v24 = vpop.f32.mrf.mxu1 }
 0x172   :  { %v3135_v0 = vor.u32 %v2408_v61, %v2023_v45  ;;  %v3187_v15 = vpop.f32.mrf.mxu0 }
 0x174   :  { %2190 = vmatmul.msk.bf16.gmra.mxu1 %vm998_vm4, %v3135_v0  ;;  %2196 = vmatmul.msk.bf16.gmra.mxu3 %vm998_vm4, %v3135_v0 }
 0x175   :  { %2202 = vmatmul.msk.bf16.gmra.mxu0 %vm998_vm4, %v3135_v0  ;;  %2208 = vmatmul.msk.bf16.gmra.mxu2 %vm998_vm4, %v3135_v0 }
 0x177   :  { %v3211_v27 = vpop.f32.mrf.mxu3 }
 0x178   :  { %v3191_v23 = vpop.f32.mrf.mxu2 }
 0x179   :  { %v3215_v30 = vpop.f32.mrf.mxu1 }
 0x17a   :  { %v3203_v25 = vpop.f32.mrf.mxu0 }
 0x17f   :  { %v3233_v35 = vpop.f32.mrf.mxu3 }
 0x180   :  { %v3213_v29 = vpop.f32.mrf.mxu2 }
 0x184   :  { %2209 = vmatmul.msk.bf16.vlgmr.msra.gmra.mxu1 %vm998_vm4, %v2953_v60  ;;  %2215 = vmatmul.msk.bf16.vlgmr.msra.gmra.mxu3 %vm998_vm4, %v2953_v60 }
 0x185   :  { %2221 = vmatmul.msk.bf16.vlgmr.msra.gmra.mxu0 %vm998_vm4, %v2953_v60  ;;  %2227 = vmatmul.msk.bf16.vlgmr.msra.gmra.mxu2 %vm998_vm4, %v2953_v60 }
 0x191   :  { %v3237_v38 = vpop.f32.mrf.mxu1 }
 0x192   :  { %v3217_v31 = vpop.f32.mrf.mxu0 }
 0x194   :  { %2210 = vmatmul.msk.bf16.gmra.mxu1 %vm998_vm4, %v2968_v36  ;;  %2216 = vmatmul.msk.bf16.gmra.mxu3 %vm998_vm4, %v2968_v36 }
 0x195   :  { %2222 = vmatmul.msk.bf16.gmra.mxu0 %vm998_vm4, %v2968_v36  ;;  %2228 = vmatmul.msk.bf16.gmra.mxu2 %vm998_vm4, %v2968_v36 }
 0x197   :  { %v3241_v40 = vpop.f32.mrf.mxu3 }
 0x198   :  { %v3235_v37 = vpop.f32.mrf.mxu2 }
 0x199   :  { %v3245_v42 = vpop.f32.mrf.mxu1 }
 0x19a   :  { %v3239_v39 = vpop.f32.mrf.mxu0 }
 0x19f   :  { %v3269_v51 = vpop.f32.mrf.mxu3 }
 0x1a0   :  { %v3243_v41 = vpop.f32.mrf.mxu2 }
 0x1a4   :  { %2211 = vmatmul.msk.bf16.gmra.mxu1 %vm998_vm4, %v2982_v12  ;;  %2217 = vmatmul.msk.bf16.gmra.mxu3 %vm998_vm4, %v2982_v12 }
 0x1a5   :  { %2223 = vmatmul.msk.bf16.gmra.mxu0 %vm998_vm4, %v2982_v12  ;;  %2229 = vmatmul.msk.bf16.gmra.mxu2 %vm998_vm4, %v2982_v12 }
 0x1b1   :  { %v1072_v54 = vpop.f32.mrf.mxu1 }
 0x1b2   :  { %v3247_v18 = vpop.f32.mrf.mxu0 }
 0x1b4   :  { %2212 = vmatmul.msk.bf16.gmra.mxu1 %vm998_vm4, %v3013_v62  ;;  %2218 = vmatmul.msk.bf16.gmra.mxu3 %vm998_vm4, %v3013_v62 }
 0x1b5   :  { %2224 = vmatmul.msk.bf16.gmra.mxu0 %vm998_vm4, %v3013_v62  ;;  %2230 = vmatmul.msk.bf16.gmra.mxu2 %vm998_vm4, %v3013_v62 }
 0x1b7   :  { %v1107_v56 = vpop.f32.mrf.mxu3 }
 0x1b8   :  { %v3271_v53 = vpop.f32.mrf.mxu2 }
 0x1b9   :  { %v3285_v20 = vpop.f32.mrf.mxu1 }
 0x1ba   :  { %v1143_v50 = vpop.f32.mrf.mxu0 }
 0x1bb   :  { %v3273_v55 = vadd.f32 %v1143_v50, %v1072_v54 }
 0x1bf   :  { %v1109_v52 = vpop.f32.mrf.mxu3 }
 0x1c0   :  { %v1178_v58 = vpop.f32.mrf.mxu2 }
 0x1c1   :  { %v3275_v59 = vadd.f32 %v1178_v58, %v1107_v56  ;;  %v1408_v56 = vadd.f32 %v3187_v15, %v3185_v63 }
 0x1c4   :  { %2213 = vmatmul.msk.bf16.gmra.mxu1 %vm998_vm4, %v3050_v57  ;;  %2219 = vmatmul.msk.bf16.gmra.mxu3 %vm998_vm4, %v3050_v57 }
 0x1c5   :  { %2225 = vmatmul.msk.bf16.gmra.mxu0 %vm998_vm4, %v3050_v57  ;;  %2231 = vmatmul.msk.bf16.gmra.mxu2 %vm998_vm4, %v3050_v57 }
 0x1d1   :  { %v1077_v45 = vpop.f32.mrf.mxu1 }
 0x1d2   :  { %v3287_v61 = vpop.f32.mrf.mxu0 }
 0x1d4   :  { %2214 = vmatmul.msk.bf16.gmra.mxu1 %vm998_vm4, %v3135_v0  ;;  %2220 = vmatmul.msk.bf16.gmra.mxu3 %vm998_vm4, %v3135_v0 }
 0x1d5   :  { %2226 = vmatmul.msk.bf16.gmra.mxu0 %vm998_vm4, %v3135_v0  ;;  %2232 = vmatmul.msk.bf16.gmra.mxu2 %vm998_vm4, %v3135_v0 }
 0x1d7   :  { %v1112_v1 = vpop.f32.mrf.mxu3 }
 0x1d8   :  { %v1181_v2 = vpop.f32.mrf.mxu2 }
 0x1d9   :  { %v3297_v3 = vadd.f32 %v1181_v2, %v1109_v52  ;;  %v1078_v5 = vpop.f32.mrf.mxu1  ;;  %v1413_v2 = vadd.f32 %v3191_v23, %v3189_v22  ;;  %v1434_v22 = vadd.f32 %v3213_v29, %v3211_v27  ;;  %v1528_v27 = vadd.f32 %v3239_v39, %v3237_v38 }
 0x1da   :  { %v1148_v6 = vpop.f32.mrf.mxu0  ;;  %v1537_v38 = vadd.f32 %v3247_v18, %v3245_v42 }
 0x1df   :  { %v1113_v7 = vpop.f32.mrf.mxu3 }
 0x1e0   :  { %v1183_v11 = vpop.f32.mrf.mxu2 }
 0x1e4   :  { %2233 = vmatmul.msk.bf16.vlgmr.msrb.gmra.mxu1 %vm998_vm4, %v2953_v60  ;;  %2239 = vmatmul.msk.bf16.vlgmr.msrb.gmra.mxu3 %vm998_vm4, %v2953_v60 }
 0x1f1   :  { %v1080_v13 = vpop.f32.mrf.mxu1 }
 0x1f2   :  { %v1150_v14 = vpop.f32.mrf.mxu0 }
 0x1f4   :  { %2234 = vmatmul.msk.bf16.gmra.mxu1 %vm998_vm4, %v2968_v36  ;;  %2240 = vmatmul.msk.bf16.gmra.mxu3 %vm998_vm4, %v2968_v36  ;;  %v1399_v36 = vadd.f32 %v3159_v10, %v3157_v9 }
 0x1f7   :  { %v1115_v4 = vpop.f32.mrf.mxu3 }
 0x1f8   :  { %v1185_v16 = vpop.f32.mrf.mxu2 }
 0x1f9   :  { %v1081_v17 = vpop.f32.mrf.mxu1 }
 0x1fa   :  { %v1151_v8 = vpop.f32.mrf.mxu0 }
 0x1ff   :  { %v1116_v26 = vpop.f32.mrf.mxu3 }
 0x200   :  { %v1186_v28 = vpop.f32.mrf.mxu2  ;;  %v1444_v26 = vadd.f32 %v3235_v37, %v3233_v35  ;;  %v1532_v35 = vadd.f32 %v3243_v41, %v3241_v40  ;;  %v1542_v41 = vadd.f32 %v3271_v53, %v3269_v51 }
 0x201   :  { %v1197_v32 = vpop.f32.mrf.mxu1 }
 0x202   :  { %v1267_v33 = vpop.f32.mrf.mxu0 }
 0x204   :  { %2235 = vmatmul.msk.bf16.gmra.mxu1 %vm998_vm4, %v2982_v12  ;;  %2241 = vmatmul.msk.bf16.gmra.mxu3 %vm998_vm4, %v2982_v12  ;;  %v1403_v12 = vadd.f32 %v3183_v21, %v3181_v19 }
 0x207   :  { %v1232_v60 = vpop.f32.mrf.mxu3 }
 0x208   :  { %v1302_v34 = vpop.f32.mrf.mxu2 }
 0x209   :  { %v1198_v43 = vpop.f32.mrf.mxu1 }
 0x20a   :  { %v1268_v44 = vpop.f32.mrf.mxu0 }
 0x20f   :  { %v1233_v46 = vpop.f32.mrf.mxu3 }
 0x210   :  { %v1303_v47 = vpop.f32.mrf.mxu2 }
 0x211   :  { %v1200_v48 = vpop.f32.mrf.mxu1  ;;  %v2451_v47 = vld [vmem:[%s3501_s5 + $0x10] sm:$0xff] }
 0x212   :  { %v1400_v49 = vadd.f32 %v1399_v36, %v1200_v48  ;;  %v1270_v54 = vpop.f32.mrf.mxu0  ;;  %1520 = vmatpush.bf16.msrb.mxu2 %v2451_v47 }
 0x214   :  { %2236 = vmatmul.msk.bf16.gmra.mxu1 %vm998_vm4, %v3013_v62  ;;  %2242 = vmatmul.msk.bf16.gmra.mxu3 %vm998_vm4, %v3013_v62  ;;  %v1430_v62 = vadd.f32 %v3203_v25, %v3201_v24  ;;  %v1439_v24 = vadd.f32 %v3217_v31, %v3215_v30 }
 0x217   :  { %v1235_v50 = vpop.f32.mrf.mxu3 }
 0x218   :  { %v1404_v58 = vadd.f32 %v1403_v12, %v1235_v50  ;;  %v1305_v52 = vpop.f32.mrf.mxu2 }
 0x219   :  { %v1202_v9 = vpop.f32.mrf.mxu1  ;;  %v1601_v52 = vadd.f32 %v3287_v61, %v3285_v20 }
 0x21a   :  { %v1409_v10 = vadd.f32 %v1408_v56, %v1202_v9  ;;  %v1271_v45 = vpop.f32.mrf.mxu0 }
 0x21b   :  { %v3321_v1 = vadd.f32 %v1400_v49, %v1271_v45 }
 0x21f   :  { %v1237_v5 = vpop.f32.mrf.mxu3 }
 0x220   :  { %v1414_v6 = vadd.f32 %v1413_v2, %v1237_v5  ;;  %v1306_v19 = vpop.f32.mrf.mxu2 }
 0x221   :  { %v3327_v21 = vadd.f32 %v1404_v58, %v1306_v19  ;;  %v1205_v7 = vpop.f32.mrf.mxu1 }
 0x222   :  { %v1431_v63 = vadd.f32 %v1430_v62, %v1205_v7  ;;  %v1274_v15 = vpop.f32.mrf.mxu0 }
 0x223   :  { %v3329_v11 = vadd.f32 %v1409_v10, %v1274_v15 }
 0x224   :  { %2237 = vmatmul.msk.bf16.gmra.mxu1 %vm998_vm4, %v3050_v57  ;;  %2243 = vmatmul.msk.bf16.gmra.mxu3 %vm998_vm4, %v3050_v57 }
 0x227   :  { %v1240_v23 = vpop.f32.mrf.mxu3 }
 0x228   :  { %v1435_v25 = vadd.f32 %v1434_v22, %v1240_v23  ;;  %v1309_v13 = vpop.f32.mrf.mxu2  ;;  %v2450_v23 = vld [vmem:[%s3501_s5 + $0x8] sm:$0xff] }
 0x229   :  { %v3339_v14 = vadd.f32 %v1414_v6, %v1309_v13  ;;  %v1207_v4 = vpop.f32.mrf.mxu1  ;;  %1521 = vmatpush.bf16.msrb.mxu2 %v2450_v23 }
 0x22a   :  { %v1440_v16 = vadd.f32 %v1439_v24, %v1207_v4  ;;  %v1276_v17 = vpop.f32.mrf.mxu0 }
 0x22b   :  { %v3341_v8 = vadd.f32 %v1431_v63, %v1276_v17 }
 0x22f   :  { %v1242_v57 = vpop.f32.mrf.mxu3 }
 0x230   :  { %v1445_v29 = vadd.f32 %v1444_v26, %v1242_v57  ;;  %v1311_v28 = vpop.f32.mrf.mxu2 }
 0x231   :  { %v3347_v32 = vadd.f32 %v1435_v25, %v1311_v28  ;;  %v1210_v30 = vpop.f32.mrf.mxu1 }
 0x232   :  { %v1529_v31 = vadd.f32 %v1528_v27, %v1210_v30  ;;  %v1279_v33 = vpop.f32.mrf.mxu0  ;;  %v2449_v27 = vld [vmem:[%s3501_s5] sm:$0xff]  ;;  %v2452_v30 = vld [vmem:[%s3501_s5 + $0x18] sm:$0xff] }
 0x233   :  { %v3349_v60 = vadd.f32 %v1440_v16, %v1279_v33  ;;  %1522 = vmatpush.bf16.msrb.mxu2 %v2449_v27 }
 0x234   :  { %2238 = vmatmul.msk.bf16.gmra.mxu1 %vm998_vm4, %v3135_v0  ;;  %2244 = vmatmul.msk.bf16.gmra.mxu3 %vm998_vm4, %v3135_v0  ;;  %v2454_v0 = vld [vmem:[%s3501_s5 + $0x28] sm:$0xff] }
 0x235   :  { %1486 = vmatpush.bf16.msrb.mxu0 %v2454_v0 }
 0x237   :  { %v1245_v37 = vpop.f32.mrf.mxu3 }
 0x238   :  { %v1533_v39 = vadd.f32 %v1532_v35, %v1245_v37  ;;  %v1314_v34 = vpop.f32.mrf.mxu2 }
 0x239   :  { %v3359_v43 = vadd.f32 %v1445_v29, %v1314_v34  ;;  %v1212_v44 = vpop.f32.mrf.mxu1 }
 0x23a   :  { %v1538_v46 = vadd.f32 %v1537_v38, %v1212_v44  ;;  %v1281_v36 = vpop.f32.mrf.mxu0 }
 0x23b   :  { %v3367_v40 = vadd.f32 %v1529_v31, %v1281_v36  ;;  %v2457_v36 = vld [vmem:[%s3501_s5 + $0x40] sm:$0xff] }
 0x23f   :  { %v1247_v42 = vpop.f32.mrf.mxu3 }
 0x240   :  { %v1543_v18 = vadd.f32 %v1542_v41, %v1247_v42  ;;  %v1316_v48 = vpop.f32.mrf.mxu2  ;;  %v2473_v41 = vld [vmem:[%s3500_s4] ss:$0 sm:$0xff] }
 0x241   :  { %v3371_v49 = vadd.f32 %v1533_v39, %v1316_v48  ;;  %v1215_v54 = vpop.f32.mrf.mxu1  ;;  %v2455_v48 = vld [vmem:[%s3501_s5 + $0x30] sm:$0xff] }
 0x242   :  { %v1593_v12 = vadd.f32 %v3273_v55, %v1215_v54  ;;  %v1284_v50 = vpop.f32.mrf.mxu0 }
 0x243   :  { %v3374_v56 = vadd.f32 %v1538_v46, %v1284_v50 }
 0x247   :  { %v1250_v58 = vpop.f32.mrf.mxu3 }
 0x248   :  { %v1597_v9 = vadd.f32 %v3275_v59, %v1250_v58  ;;  %v1319_v10 = vpop.f32.mrf.mxu2 }
 0x249   :  { %v3379_v45 = vadd.f32 %v1543_v18, %v1319_v10  ;;  %v1217_v51 = vpop.f32.mrf.mxu1 }
 0x24a   :  { %v1602_v53 = vadd.f32 %v1601_v52, %v1217_v51  ;;  %v1286_v2 = vpop.f32.mrf.mxu0  ;;  %v2460_v51 = vld [vmem:[%s3501_s5 + $0x58] sm:$0xff] }
 0x24b   :  { %v3381_v5 = vadd.f32 %v1593_v12, %v1286_v2  ;;  %1647 = vmatpush.bf16.msra.mxu2 %v2460_v51 }
 0x24f   :  { %v1252_v62 = vpop.f32.mrf.mxu3 }
 0x250   :  { %v1607_v55 = vadd.f32 %v3297_v3, %v1252_v62  ;;  %v1321_v6 = vpop.f32.mrf.mxu2  ;;  %v2453_v3 = vld [vmem:[%s3501_s5 + $0x20] sm:$0xff] }
 0x251   :  { %v3384_v19 = vadd.f32 %v1597_v9, %v1321_v6  ;;  %v1220_v7 = vpop.f32.mrf.mxu1  ;;  %1487 = vmatpush.bf16.msrb.mxu0 %v2453_v3  ;;  %v2458_v6 = vld [vmem:[%s3501_s5 + $0x48] sm:$0xff] }
 0x252   :  { %v1289_v63 = vpop.f32.mrf.mxu0 }
 0x253   :  { %v3386_v15 = vadd.f32 %v1602_v53, %v1289_v63 }
 0x255   :  { %1488 = vmatpush.bf16.msrb.mxu0 %v2452_v30 }
 0x257   :  { %v1255_v20 = vpop.f32.mrf.mxu3 }
 0x258   :  { %v1324_v59 = vpop.f32.mrf.mxu2 }
 0x259   :  { %v3388_v61 = vadd.f32 %v1607_v55, %v1324_v59  ;;  %v1221_v22 = vpop.f32.mrf.mxu1  ;;  %1583 = vmatpush.bf16.msra.mxu0 %v2457_v36 }
 0x25a   :  { %v1291_v24 = vpop.f32.mrf.mxu0 }
 0x25f   :  { %v1256_v25 = vpop.f32.mrf.mxu3 }
 0x260   :  { %v1326_v13 = vpop.f32.mrf.mxu2 }
 0x261   :  { %v1337_v4 = vpop.f32.mrf.mxu1 }
 0x267   :  { %v1372_v16 = vpop.f32.mrf.mxu3 }
 0x269   :  { %v1338_v17 = vpop.f32.mrf.mxu1 }
 0x26f   :  { %v1373_v26 = vpop.f32.mrf.mxu3 }
 0x271   :  { %v1340_v57 = vpop.f32.mrf.mxu1 }
 0x277   :  { %v1375_v29 = vpop.f32.mrf.mxu3 }
 0x279   :  { %v1341_v28 = vpop.f32.mrf.mxu1 }
 0x27f   :  { %v1376_v31 = vpop.f32.mrf.mxu3 }
 0x281   :  { %v1343_v33 = vpop.f32.mrf.mxu1 }
 0x282   :  { %v1402_v37 = vadd.f32 %v3321_v1, %v1343_v33 }
 0x287   :  { %v1378_v35 = vpop.f32.mrf.mxu3 }
 0x288   :  { %v1406_v38 = vadd.f32 %v3327_v21, %v1378_v35  ;;  %v2456_v21 = vld [vmem:[%s3501_s5 + $0x38] sm:$0xff] }
 0x289   :  { %v1345_v39 = vpop.f32.mrf.mxu1  ;;  %1584 = vmatpush.bf16.msra.mxu0 %v2456_v21  ;;  %v2358_v21 = vld [vmem:[%s3505_s9 + $0x18] sm:$0xf] }
 0x28a   :  { %v1407_v34 = vmax.f32 %v1402_v37, %v1406_v38  ;;  %v1411_v44 = vadd.f32 %v3329_v11, %v1345_v39  ;;  %v2467_v39 = vld [vmem:[%s3504_s7 + $0x30] sm:$0xff] }
 0x28c   :  { %v1412_v46 = vmax.f32 %v1407_v34, %v1411_v44  ;;  %v2466_v34 = vld [vmem:[%s3504_s7 + $0x28] sm:$0xff]  ;;  %v2465_v44 = vld [vmem:[%s3504_s7 + $0x20] sm:$0xff] }
 0x28d   :  { %1585 = vmatpush.bf16.msra.mxu0 %v2455_v48 }
 0x28f   :  { %v1380_v47 = vpop.f32.mrf.mxu3 }
 0x290   :  { %v1416_v0 = vadd.f32 %v3339_v14, %v1380_v47 }
 0x291   :  { %v1348_v1 = vpop.f32.mrf.mxu1 }
 0x292   :  { %v1417_v42 = vmax.f32 %v1412_v46, %v1416_v0  ;;  %v1433_v12 = vadd.f32 %v3341_v8, %v1348_v1  ;;  %v2464_v46 = vld [vmem:[%s3504_s7 + $0x18] sm:$0xff]  ;;  %v2463_v0 = vld [vmem:[%s3504_s7 + $0x10] sm:$0xff] }
 0x294   :  { %v1421_v11 = vadd.f32 %v2473_v41, %v1417_v42  ;;  %v2461_v42 = vld [vmem:[%s3504_s7] sm:$0xff] }
 0x296   :  { %v1422_v18 = vmax.f32 %v1421_v11, 0.0  ;;  %v2471_v11 = vld [vmem:[%s3505_s9 + $0x18] sm:$0x30] }
 0x297   :  { %v1383_v54 = vpop.f32.mrf.mxu3  ;;  %v2359_v48 = vor.u32 %v2471_v11, %v2358_v21 }
 0x298   :  { %v1423_v14 = vpack.c.bf16 %v1422_v18, %v1422_v18  ;;  %v1437_v50 = vadd.f32 %v3347_v32, %v1383_v54  ;;  %v2459_v32 = vld [vmem:[%s3501_s5 + $0x50] sm:$0xff] }
 0x299   :  { %v1350_v58 = vpop.f32.mrf.mxu1  ;;  %1648 = vmatpush.bf16.msra.mxu2 %v2459_v32  ;;  %v1789_v54 = vsel %vm314_vm0, %v2359_v48, 0  ;;  %v2468_v32 = vld [vmem:[%s3505_s9] sm:$0xff] }
 0x29a   :  { %v1438_v52 = vmax.f32 %v1433_v12, %v1437_v50  ;;  %v1442_v9 = vadd.f32 %v3349_v60, %v1350_v58  ;;  %2276 = vmatmul.msk.bf16.vlgmr.msrb.gmra.mxu2 %vm1477_vm5, %v1423_v14  ;;  %v2470_v14 = vld [vmem:[%s3505_s9 + $0x10] sm:$0xff]  ;;  %v2469_v12 = vld [vmem:[%s3505_s9 + $0x8] sm:$0xff] }
 0x29c   :  { %v1443_v10 = vmax.f32 %v1438_v52, %v1442_v9  ;;  %v2474_v9 = vld [vmem:[%s3502_s6] ss:$0 sm:$0xff] }
 0x29d   :  { %1649 = vmatpush.bf16.msra.mxu2 %v2458_v6 }
 0x29f   :  { %v1385_v53 = vpop.f32.mrf.mxu3 }
 0x2a0   :  { %v1447_v2 = vadd.f32 %v3359_v43, %v1385_v53 }
 0x2a1   :  { %v1353_v62 = vpop.f32.mrf.mxu1  ;;  %1795 = vmatpush.bf16.msrb.mxu2 %v1789_v54 }
 0x2a2   :  { %v1448_v8 = vmax.f32 %v1443_v10, %v1447_v2  ;;  %v1531_v20 = vadd.f32 %v3367_v40, %v1353_v62 }
 0x2a4   :  { %v1449_v55 = vadd.f32 %v2473_v41, %v1448_v8 }
 0x2a5   :  { %1796 = vmatpush.bf16.msrb.mxu2 %v2470_v14 }
 0x2a6   :  { %v1450_v60 = vmax.f32 %v1449_v55, 0.0  ;;  %v2475_v55 = vld [vmem:[%s3503_s8] ss:$0 sm:$0xff] }
 0x2a7   :  { %v1388_v7 = vpop.f32.mrf.mxu3 }
 0x2a8   :  { %v1451_v63 = vpack.c.bf16 %v1450_v60, %v1450_v60  ;;  %v1535_v59 = vadd.f32 %v3371_v49, %v1388_v7 }
 0x2a9   :  { %v1355_v43 = vpop.f32.mrf.mxu1  ;;  %1797 = vmatpush.bf16.msrb.mxu2 %v2469_v12 }
 0x2aa   :  { %v1536_v22 = vmax.f32 %v1531_v20, %v1535_v59  ;;  %v1540_v23 = vadd.f32 %v3374_v56, %v1355_v43  ;;  %2263 = vmatmul.msk.bf16.vlgmr.msrb.gmra.mxu0 %vm1477_vm5, %v1451_v63  ;;  %v2476_v59 = vld [vmem:[%s3506_s10] ss:$0 sm:$0xff] }
 0x2ac   :  { %v1541_v3 = vmax.f32 %v1536_v22, %v1540_v23 }
 0x2ad   :  { %1798 = vmatpush.bf16.msrb.mxu2 %v2468_v32 }
 0x2af   :  { %v1390_v24 = vpop.f32.mrf.mxu3 }
 0x2b0   :  { %v1545_v25 = vadd.f32 %v3379_v45, %v1390_v24 }
 0x2b1   :  { %v1358_v13 = vpop.f32.mrf.mxu1 }
 0x2b2   :  { %v1546_v4 = vmax.f32 %v1541_v3, %v1545_v25  ;;  %v1595_v40 = vadd.f32 %v3381_v5, %v1358_v13  ;;  %v1677_v5 = vld [vmem:[%s3504_s7 + $0x38] sm:$0xf] }
 0x2b4   :  { %v1547_v16 = vadd.f32 %v2473_v41, %v1546_v4 }
 0x2b6   :  { %v1548_v17 = vmax.f32 %v1547_v16, 0.0 }
 0x2b7   :  { %v1393_v26 = vpop.f32.mrf.mxu3 }
 0x2b8   :  { %v1549_v57 = vpack.c.bf16 %v1548_v17, %v1548_v17  ;;  %v1599_v49 = vadd.f32 %v3384_v19, %v1393_v26  ;;  %v1711_v19 = vunpack.c.l.b16 %v1677_v5 }
 0x2b9   :  { %v1360_v27 = vpop.f32.mrf.mxu1 }
 0x2ba   :  { %v1600_v29 = vmax.f32 %v1595_v40, %v1599_v49  ;;  %v1604_v56 = vadd.f32 %v3386_v15, %v1360_v27  ;;  %2295 = vmatmul.msk.bf16.vlgmr.msra.gmra.mxu0 %vm1477_vm5, %v1549_v57  ;;  %v1719_v38 = vpack.c.b16 %v1711_v19, %v1711_v19 }
 0x2bc   :  { %v1605_v28 = vmax.f32 %v1600_v29, %v1604_v56  ;;  %v1732_v15 = vsel %vm1017_vm2, %v1719_v38, 0 }
 0x2bd   :  { %1734 = vmatpush.bf16.msrb.mxu0 %v1732_v15 }
 0x2bf   :  { %v1395_v30 = vpop.f32.mrf.mxu3 }
 0x2c0   :  { %v1609_v45 = vadd.f32 %v3388_v61, %v1395_v30 }
 0x2c1   :  { %1735 = vmatpush.bf16.msrb.mxu0 %v2467_v39 }
 0x2c2   :  { %v1610_v31 = vmax.f32 %v1605_v28, %v1609_v45 }
 0x2c4   :  { %v1611_v33 = vadd.f32 %v2473_v41, %v1610_v31  ;;  %v2462_v41 = vld [vmem:[%s3504_s7 + $0x8] sm:$0xff] }
 0x2c5   :  { %1736 = vmatpush.bf16.msrb.mxu0 %v2466_v34 }
 0x2c6   :  { %v1612_v35 = vmax.f32 %v1611_v33, 0.0 }
 0x2c8   :  { %v1613_v37 = vpack.c.bf16 %v1612_v35, %v1612_v35 }
 0x2c9   :  { %1737 = vmatpush.bf16.msrb.mxu0 %v2465_v44 }
 0x2ca   :  { %2314 = vmatmul.msk.bf16.vlgmr.msra.gmra.mxu2 %vm1477_vm5, %v1613_v37 }
 0x2cd   :  { %1738 = vmatpush.bf16.msrb.mxu0 %v2464_v46 }
 0x2d1   :  { %1739 = vmatpush.bf16.msrb.mxu0 %v2463_v0 }
 0x2d5   :  { %1740 = vmatpush.bf16.msrb.mxu0 %v2462_v41 }
 0x2d9   :  { %1741 = vmatpush.bf16.msrb.mxu0 %v2461_v42 }
 0x31d   :  { %v1524_v61 = vpop.f32.mrf.mxu2 }
 0x325   :  { %v1526_v36 = vpop.f32.mrf.mxu2 }
 0x327   :  { %v1490_v47 = vpop.f32.mrf.mxu0 }
 0x328   :  { %v1525_v58 = vadd.f32 %v1524_v61, %v1490_v47 }
 0x32f   :  { %v1492_v1 = vpop.f32.mrf.mxu0 }
 0x337   :  { %v1587_v18 = vpop.f32.mrf.mxu0 }
 0x338   :  { %v1591_v52 = vadd.f32 %v1587_v18, %v1525_v58 }
 0x33f   :  { %v1589_v50 = vpop.f32.mrf.mxu0 }
 0x34d   :  { %v1651_v10 = vpop.f32.mrf.mxu2 }
 0x34e   :  { %v1655_v51 = vadd.f32 %v1651_v10, %v1591_v52 }
 0x350   :  { %v1660_v53 = vadd.f32 %v2474_v9, %v1655_v51 }
 0x352   :  { %v1661_v2 = vmax.f32 %v1660_v53, 0.0 }
 0x354   :  { %v1662_v62 = vpack.c.bf16 %v1661_v2, %v1661_v2 }
 0x355   :  { %v1653_v8 = vpop.f32.mrf.mxu2 }
 0x356   :  { %2343 = vmatmul.msk.bf16.vlgmr.msrb.gmra.mxu0 %vm1727_vm6, %v1662_v62 }
 0x3d3   :  { %v1743_v60 = vpop.f32.mrf.mxu0 }
 0x3d4   :  { %v1744_v6 = vadd.f32 %v2475_v55, %v1743_v60 }
 0x3d6   :  { %v1747_v7 = vmax.f32 %v1744_v6, 0.0 }
 0x3d8   :  { %v1748_v63 = vpack.c.bf16 %v1747_v7, %v1747_v7 }
 0x3da   :  { %2360 = vmatmul.msk.bf16.vlgmr.msrb.gmra.mxu2 %vm1784_vm7, %v1748_v63 }
 0x3db   :  { %v1745_v20 = vpop.f32.mrf.mxu0 }
 0x45d   :  { %v1800_v43 = vpop.f32.mrf.mxu2 }
 0x45e   :  { %v1801_v22 = vadd.f32 %v2476_v59, %v1800_v43 }
 0x460   :  { %1804 = vst [vmem:[%s3507_s11] sm:$0xff] %v1801_v22 }
 0x465   :  { %v1802_v23 = vpop.f32.mrf.mxu2 }

</bundles_post_ra>
